<compile_context>
chip_gen: v5e
topology: v5e:2x2
jax: 0.10.0
libtpu: 0.0.40
codegen_flags: <defaults>
</compile_context>

<pallas_src>
import functools

import jax
import jax.numpy as jnp
from jax.experimental import pallas as pl
from jax.experimental.pallas import tpu as pltpu


def _conv_elu_kernel(x_ref, w_ref, b_ref, o_ref, *, ksize, wp):
    # x_ref: (L, Cin)        zero-padded image, flattened as row*Wp + col
    # w_ref: (K*K*Cin, Cout) taps stacked as ((kh*K + kw)*Cin + ci, co)
    # b_ref: (1, Cout)       bias
    # o_ref: (Ho*Wp, Cout)   output with Wp-strided rows (wrap cols trimmed outside)
    n_out, cout = o_ref.shape
    cin = x_ref.shape[1]

    acc = jnp.zeros((n_out, cout), dtype=jnp.float32)
    for kh in range(ksize):
        for kw in range(ksize):
            off = kh * wp + kw
            tap = kh * ksize + kw
            xs = x_ref[off:off + n_out, :]                    # (n_out, Cin)
            wt = w_ref[tap * cin:(tap + 1) * cin, :]          # (Cin, Cout)
            acc = acc + jnp.dot(xs, wt, preferred_element_type=jnp.float32)

    acc = acc + b_ref[...]                                    # bias, broadcast over rows
    # ELU(alpha=1): x if x > 0 else exp(x) - 1
    o_ref[...] = jnp.where(acc > 0.0, acc, jnp.exp(acc) - 1.0).astype(o_ref.dtype)


def basic_block(x, weight, bias, *, ksize=3, stride=1, pad=1):
    """ELU(Conv2d(x, weight, bias)) with PyTorch NCHW / OIHW semantics."""
    assert stride == 1  # TODO(synk): strided conv not implemented (module default is 1)
    N, Cin, H, W = x.shape
    Cout = weight.shape[0]
    assert weight.shape == (Cout, Cin, ksize, ksize)

    Hp, Wp = H + 2 * pad, W + 2 * pad
    Ho, Wo = Hp - ksize + 1, Wp - ksize + 1

    # NCHW -> NHWC (channels onto lanes), zero-pad spatially; one extra bottom
    # row keeps every tap's flat slice in-bounds inside the kernel.
    x_nhwc = jnp.transpose(x, (0, 2, 3, 1))
    xp = jnp.pad(x_nhwc, ((0, 0), (pad, pad + 1), (pad, pad), (0, 0)))
    L = (Hp + 1) * Wp
    x_flat = xp.reshape(N, L, Cin)

    # OIHW -> (K*K*Cin, Cout), row index = (kh*K + kw)*Cin + ci
    w_taps = jnp.transpose(weight, (2, 3, 1, 0)).reshape(ksize * ksize * Cin, Cout)
    w_taps = w_taps.astype(jnp.float32)
    b_row = bias.reshape(1, Cout).astype(jnp.float32)

    n_out = Ho * Wp
    kernel = functools.partial(_conv_elu_kernel, ksize=ksize, wp=Wp)
    out_flat = pl.pallas_call(
        kernel,
        out_shape=jax.ShapeDtypeStruct((N, n_out, Cout), x.dtype),
        grid_spec=pltpu.PrefetchScalarGridSpec(
            num_scalar_prefetch=0,
            grid=(N,),
            in_specs=[
                pl.BlockSpec((None, L, Cin), lambda n: (n, 0, 0)),        # image
                pl.BlockSpec((ksize * ksize * Cin, Cout), lambda n: (0, 0)),  # weights
                pl.BlockSpec((1, Cout), lambda n: (0, 0)),                # bias
            ],
            out_specs=pl.BlockSpec((None, n_out, Cout), lambda n: (n, 0, 0)),
        ),
        compiler_params=pltpu.CompilerParams(
            dimension_semantics=("parallel",),
            vmem_limit_bytes=32 * 1024 * 1024,
        ),
    )(x_flat, w_taps, b_row)

    # Drop the Wp - Wo wrap columns, then back to NCHW (PyTorch layout).
    out = out_flat.reshape(N, Ho, Wp, Cout)[:, :, :Wo, :]
    return jnp.transpose(out, (0, 3, 1, 2))


if __name__ == "__main__":
    key = jax.random.PRNGKey(0)
    k_x, k_w, k_b = jax.random.split(key, 3)

    N, Cin, H, W = 2, 4, 16, 16
    Cout, K = 8, 3

    x = jax.random.normal(k_x, (N, Cin, H, W), dtype=jnp.float32)
    # init_weights() in the reference is a no-op (default init); any deterministic
    # parameters exercise the same forward-pass semantics.
    weight = 0.1 * jax.random.normal(k_w, (Cout, Cin, K, K), dtype=jnp.float32)
    bias = 0.1 * jax.random.normal(k_b, (Cout,), dtype=jnp.float32)

    out = basic_block(x, weight, bias)
    out = jax.block_until_ready(out)

    # Reference: XLA conv + bias + ELU with identical semantics.
    ref = jax.lax.conv_general_dilated(
        x, weight, window_strides=(1, 1), padding=((1, 1), (1, 1)),
        dimension_numbers=("NCHW", "OIHW", "NCHW"))
    ref = ref + bias[None, :, None, None]
    ref = jnp.where(ref > 0.0, ref, jnp.exp(ref) - 1.0)

    assert out.shape == ref.shape and out.dtype == ref.dtype
    assert jnp.allclose(out, ref, atol=1e-4, rtol=1e-4), float(
        jnp.max(jnp.abs(out - ref)))
    print("KERNEL_OK")
</pallas_src>

<mosaic_0001>
module attributes {stable_mosaic.version = 11 : i64} {
  func.func @_conv_elu_kernel(%arg0: i32, %arg1: memref<1x342x4xf32, #tpu.memory_space<vmem>>, %arg2: memref<36x8xf32, #tpu.memory_space<vmem>>, %arg3: memref<1x8xf32, #tpu.memory_space<vmem>>, %arg4: memref<1x288x8xf32, #tpu.memory_space<vmem>>) attributes {dimension_semantics = [#tpu.dimension_semantics<parallel>], iteration_bounds = array<i64: 2>, scalar_prefetch = 0 : i64, scratch_operands = 0 : i64, tpu.core_type = #tpu.core_type<tc>, window_params = [{transform_indices = @transform_0, window_bounds = array<i64: 1, 342, 4>}, {pipeline_mode = #tpu.pipeline_mode<synchronous>, transform_indices = @transform_1, window_bounds = array<i64: 36, 8>}, {pipeline_mode = #tpu.pipeline_mode<synchronous>, transform_indices = @transform_2, window_bounds = array<i64: 1, 8>}, {transform_indices = @transform_3, window_bounds = array<i64: 1, 288, 8>}]} {
    %cst = arith.constant 0.000000e+00 : f32
    %0 = vector.broadcast %cst : f32 to vector<288x8xf32>
    %c0 = arith.constant 0 : index
    %c0_0 = arith.constant 0 : index
    %c0_1 = arith.constant 0 : index
    %1 = vector.load %arg1[%c0, %c0_0, %c0_1] : memref<1x342x4xf32, #tpu.memory_space<vmem>>, vector<1x288x4xf32>
    %2 = vector.shape_cast %1 : vector<1x288x4xf32> to vector<288x4xf32>
    %c0_2 = arith.constant 0 : index
    %c0_3 = arith.constant 0 : index
    %3 = vector.load %arg2[%c0_2, %c0_3] : memref<36x8xf32, #tpu.memory_space<vmem>>, vector<4x8xf32>
    %cst_4 = arith.constant dense<0.000000e+00> : vector<288x8xf32>
    %4 = tpu.matmul %2, %3, %cst_4 {dimension_numbers = #tpu.dot_dimension_numbers<[1], [0], [0], [1], [0, 0, 1, 1], [], []>} : vector<288x4xf32>, vector<4x8xf32>, vector<288x8xf32> -> vector<288x8xf32>
    %5 = arith.addf %0, %4 : vector<288x8xf32>
    %c0_5 = arith.constant 0 : index
    %c1 = arith.constant 1 : index
    %c0_6 = arith.constant 0 : index
    %6 = vector.load %arg1[%c0_5, %c1, %c0_6] : memref<1x342x4xf32, #tpu.memory_space<vmem>>, vector<1x288x4xf32>
    %7 = vector.shape_cast %6 : vector<1x288x4xf32> to vector<288x4xf32>
    %c4 = arith.constant 4 : index
    %c0_7 = arith.constant 0 : index
    %8 = vector.load %arg2[%c4, %c0_7] : memref<36x8xf32, #tpu.memory_space<vmem>>, vector<4x8xf32>
    %cst_8 = arith.constant dense<0.000000e+00> : vector<288x8xf32>
    %9 = tpu.matmul %7, %8, %cst_8 {dimension_numbers = #tpu.dot_dimension_numbers<[1], [0], [0], [1], [0, 0, 1, 1], [], []>} : vector<288x4xf32>, vector<4x8xf32>, vector<288x8xf32> -> vector<288x8xf32>
    %10 = arith.addf %5, %9 : vector<288x8xf32>
    %c0_9 = arith.constant 0 : index
    %c2 = arith.constant 2 : index
    %c0_10 = arith.constant 0 : index
    %11 = vector.load %arg1[%c0_9, %c2, %c0_10] : memref<1x342x4xf32, #tpu.memory_space<vmem>>, vector<1x288x4xf32>
    %12 = vector.shape_cast %11 : vector<1x288x4xf32> to vector<288x4xf32>
    %c8 = arith.constant 8 : index
    %c0_11 = arith.constant 0 : index
    %13 = vector.load %arg2[%c8, %c0_11] : memref<36x8xf32, #tpu.memory_space<vmem>>, vector<4x8xf32>
    %cst_12 = arith.constant dense<0.000000e+00> : vector<288x8xf32>
    %14 = tpu.matmul %12, %13, %cst_12 {dimension_numbers = #tpu.dot_dimension_numbers<[1], [0], [0], [1], [0, 0, 1, 1], [], []>} : vector<288x4xf32>, vector<4x8xf32>, vector<288x8xf32> -> vector<288x8xf32>
    %15 = arith.addf %10, %14 : vector<288x8xf32>
    %c0_13 = arith.constant 0 : index
    %c18 = arith.constant 18 : index
    %c0_14 = arith.constant 0 : index
    %16 = vector.load %arg1[%c0_13, %c18, %c0_14] : memref<1x342x4xf32, #tpu.memory_space<vmem>>, vector<1x288x4xf32>
    %17 = vector.shape_cast %16 : vector<1x288x4xf32> to vector<288x4xf32>
    %c12 = arith.constant 12 : index
    %c0_15 = arith.constant 0 : index
    %18 = vector.load %arg2[%c12, %c0_15] : memref<36x8xf32, #tpu.memory_space<vmem>>, vector<4x8xf32>
    %cst_16 = arith.constant dense<0.000000e+00> : vector<288x8xf32>
    %19 = tpu.matmul %17, %18, %cst_16 {dimension_numbers = #tpu.dot_dimension_numbers<[1], [0], [0], [1], [0, 0, 1, 1], [], []>} : vector<288x4xf32>, vector<4x8xf32>, vector<288x8xf32> -> vector<288x8xf32>
    %20 = arith.addf %15, %19 : vector<288x8xf32>
    %c0_17 = arith.constant 0 : index
    %c19 = arith.constant 19 : index
    %c0_18 = arith.constant 0 : index
    %21 = vector.load %arg1[%c0_17, %c19, %c0_18] : memref<1x342x4xf32, #tpu.memory_space<vmem>>, vector<1x288x4xf32>
    %22 = vector.shape_cast %21 : vector<1x288x4xf32> to vector<288x4xf32>
    %c16 = arith.constant 16 : index
    %c0_19 = arith.constant 0 : index
    %23 = vector.load %arg2[%c16, %c0_19] : memref<36x8xf32, #tpu.memory_space<vmem>>, vector<4x8xf32>
    %cst_20 = arith.constant dense<0.000000e+00> : vector<288x8xf32>
    %24 = tpu.matmul %22, %23, %cst_20 {dimension_numbers = #tpu.dot_dimension_numbers<[1], [0], [0], [1], [0, 0, 1, 1], [], []>} : vector<288x4xf32>, vector<4x8xf32>, vector<288x8xf32> -> vector<288x8xf32>
    %25 = arith.addf %20, %24 : vector<288x8xf32>
    %c0_21 = arith.constant 0 : index
    %c20 = arith.constant 20 : index
    %c0_22 = arith.constant 0 : index
    %26 = vector.load %arg1[%c0_21, %c20, %c0_22] : memref<1x342x4xf32, #tpu.memory_space<vmem>>, vector<1x288x4xf32>
    %27 = vector.shape_cast %26 : vector<1x288x4xf32> to vector<288x4xf32>
    %c20_23 = arith.constant 20 : index
    %c0_24 = arith.constant 0 : index
    %28 = vector.load %arg2[%c20_23, %c0_24] : memref<36x8xf32, #tpu.memory_space<vmem>>, vector<4x8xf32>
    %cst_25 = arith.constant dense<0.000000e+00> : vector<288x8xf32>
    %29 = tpu.matmul %27, %28, %cst_25 {dimension_numbers = #tpu.dot_dimension_numbers<[1], [0], [0], [1], [0, 0, 1, 1], [], []>} : vector<288x4xf32>, vector<4x8xf32>, vector<288x8xf32> -> vector<288x8xf32>
    %30 = arith.addf %25, %29 : vector<288x8xf32>
    %c0_26 = arith.constant 0 : index
    %c36 = arith.constant 36 : index
    %c0_27 = arith.constant 0 : index
    %31 = vector.load %arg1[%c0_26, %c36, %c0_27] : memref<1x342x4xf32, #tpu.memory_space<vmem>>, vector<1x288x4xf32>
    %32 = vector.shape_cast %31 : vector<1x288x4xf32> to vector<288x4xf32>
    %c24 = arith.constant 24 : index
    %c0_28 = arith.constant 0 : index
    %33 = vector.load %arg2[%c24, %c0_28] : memref<36x8xf32, #tpu.memory_space<vmem>>, vector<4x8xf32>
    %cst_29 = arith.constant dense<0.000000e+00> : vector<288x8xf32>
    %34 = tpu.matmul %32, %33, %cst_29 {dimension_numbers = #tpu.dot_dimension_numbers<[1], [0], [0], [1], [0, 0, 1, 1], [], []>} : vector<288x4xf32>, vector<4x8xf32>, vector<288x8xf32> -> vector<288x8xf32>
    %35 = arith.addf %30, %34 : vector<288x8xf32>
    %c0_30 = arith.constant 0 : index
    %c37 = arith.constant 37 : index
    %c0_31 = arith.constant 0 : index
    %36 = vector.load %arg1[%c0_30, %c37, %c0_31] : memref<1x342x4xf32, #tpu.memory_space<vmem>>, vector<1x288x4xf32>
    %37 = vector.shape_cast %36 : vector<1x288x4xf32> to vector<288x4xf32>
    %c28 = arith.constant 28 : index
    %c0_32 = arith.constant 0 : index
    %38 = vector.load %arg2[%c28, %c0_32] : memref<36x8xf32, #tpu.memory_space<vmem>>, vector<4x8xf32>
    %cst_33 = arith.constant dense<0.000000e+00> : vector<288x8xf32>
    %39 = tpu.matmul %37, %38, %cst_33 {dimension_numbers = #tpu.dot_dimension_numbers<[1], [0], [0], [1], [0, 0, 1, 1], [], []>} : vector<288x4xf32>, vector<4x8xf32>, vector<288x8xf32> -> vector<288x8xf32>
    %40 = arith.addf %35, %39 : vector<288x8xf32>
    %c0_34 = arith.constant 0 : index
    %c38 = arith.constant 38 : index
    %c0_35 = arith.constant 0 : index
    %41 = vector.load %arg1[%c0_34, %c38, %c0_35] : memref<1x342x4xf32, #tpu.memory_space<vmem>>, vector<1x288x4xf32>
    %42 = vector.shape_cast %41 : vector<1x288x4xf32> to vector<288x4xf32>
    %c32 = arith.constant 32 : index
    %c0_36 = arith.constant 0 : index
    %43 = vector.load %arg2[%c32, %c0_36] : memref<36x8xf32, #tpu.memory_space<vmem>>, vector<4x8xf32>
    %cst_37 = arith.constant dense<0.000000e+00> : vector<288x8xf32>
    %44 = tpu.matmul %42, %43, %cst_37 {dimension_numbers = #tpu.dot_dimension_numbers<[1], [0], [0], [1], [0, 0, 1, 1], [], []>} : vector<288x4xf32>, vector<4x8xf32>, vector<288x8xf32> -> vector<288x8xf32>
    %45 = arith.addf %40, %44 : vector<288x8xf32>
    %c0_38 = arith.constant 0 : index
    %c0_39 = arith.constant 0 : index
    %46 = vector.load %arg3[%c0_38, %c0_39] : memref<1x8xf32, #tpu.memory_space<vmem>>, vector<1x8xf32>
    %47 = vector.broadcast %46 : vector<1x8xf32> to vector<288x8xf32>
    %48 = arith.addf %45, %47 : vector<288x8xf32>
    %cst_40 = arith.constant 0.000000e+00 : f32
    %49 = vector.broadcast %cst_40 : f32 to vector<288x8xf32>
    %50 = arith.cmpf ogt, %48, %49 : vector<288x8xf32>
    %51 = math.exp %48 : vector<288x8xf32>
    %cst_41 = arith.constant 1.000000e+00 : f32
    %52 = vector.broadcast %cst_41 : f32 to vector<288x8xf32>
    %53 = arith.subf %51, %52 : vector<288x8xf32>
    %54 = arith.select %50, %48, %53 : vector<288x8xi1>, vector<288x8xf32>
    %c0_42 = arith.constant 0 : index
    %c0_43 = arith.constant 0 : index
    %c0_44 = arith.constant 0 : index
    %55 = vector.load %arg4[%c0_42, %c0_43, %c0_44] : memref<1x288x8xf32, #tpu.memory_space<vmem>>, vector<1x288x8xf32>
    %56 = vector.shape_cast %55 : vector<1x288x8xf32> to vector<288x8xf32>
    %57 = vector.shape_cast %54 : vector<288x8xf32> to vector<1x288x8xf32>
    tpu.vector_store %arg4[%c0_42, %c0_43, %c0_44], %57 {strides = array<i32>} : memref<1x288x8xf32, #tpu.memory_space<vmem>>, vector<1x288x8xf32>,
    return
  }
  func.func @transform_0(%arg0: i32) -> (i32, i32, i32) {
    %c0_i32 = arith.constant 0 : i32
    %c0_i32_0 = arith.constant 0 : i32
    %c0_i32_1 = arith.constant 0 : i32
    return %arg0, %c0_i32, %c0_i32_0 : i32, i32, i32
  }
  func.func @transform_1(%arg0: i32) -> (i32, i32) {
    %c0_i32 = arith.constant 0 : i32
    %c0_i32_0 = arith.constant 0 : i32
    %c0_i32_1 = arith.constant 0 : i32
    return %c0_i32, %c0_i32_0 : i32, i32
  }
  func.func @transform_2(%arg0: i32) -> (i32, i32) {
    %c0_i32 = arith.constant 0 : i32
    %c0_i32_0 = arith.constant 0 : i32
    %c0_i32_1 = arith.constant 0 : i32
    return %c0_i32, %c0_i32_0 : i32, i32
  }
  func.func @transform_3(%arg0: i32) -> (i32, i32, i32) {
    %c0_i32 = arith.constant 0 : i32
    %c0_i32_0 = arith.constant 0 : i32
    %c0_i32_1 = arith.constant 0 : i32
    return %arg0, %c0_i32, %c0_i32_0 : i32, i32, i32
  }
}

</mosaic_0001>

<bundles_post_ra>
// kernel: tpu_custom_call.1
= control target key start
LH: loop header
LB: loop body
LE: loop exit
PB: predicated region body
PF: predicated region fallthrough
CT: control target
= control target key end

     0   :  { %s3687_s12 = smov 0   ;;  %s4665_s0 = inlined_call_operand.vmem [shape: f32[2,342,4], index: 0, kind: input, shape index: {}]   ;;  %s4666_s1 = inlined_call_operand.vmem [shape: f32[36,8], index: 1, kind: input, shape index: {}]   ;;  %s4667_s2 = inlined_call_operand.vmem [shape: f32[1,8], index: 2, kind: input, shape index: {}]   ;;  %s4668_s3 = inlined_call_operand.vmem [shape: f32[2,288,8], index: 3, kind: output, shape index: {}]  }
   0x1 LB: > { %s3194_s13 = sadd.s32 4294967295, %s3665_s12   ;;  %p3198_p0 = scmp.ge.s32.totalorder %s3665_s12, 1  ;;  %s3665_s12 = sphi %s3687_s12, %s13_s12  }
   0x2   : > { %p137_p1 = scmp.lt.s32.totalorder %s3665_s12, 3 }
   0x4   : > { %p138_p2 = pnand %p3198_p0, %p137_p1 }
   0x5   : > { %p161_p3 = scmp.lt.s32.totalorder (!%p138_p2), %s3194_s13, 1 }
   0x6   : > { %141 = sbr.rel (%p138_p2) target bundleno = 810 (0x32a), region = 32 }
   0xb   : > { %v244_v0 = vld [vmem:[%s4666_s1 + $0x4] sm:$0xf]  ;;  %vm354_vm0 = vcmask 1043456   ;;  %v755_v1 = vld [vmem:[%s4666_s1 + $0x8] sm:$0xf]  ;;  %s4670_s13 = smov (!%p161_p3, %s3194_s13), 1 }
   0xc   : > { %3572 = vmatpush.msk.msra.mxu1 %vm354_vm0, %v244_v0  ;;  %3573 = vmatpush.msk.msra.mxu2 %vm354_vm0, %v244_v0  ;;  %v1064_v2 = vld [vmem:[%s4666_s1 + $0xc] sm:$0xf]  ;;  %v207_v3 = vld [vmem:[%s4666_s1] sm:$0xf]  ;;  %v1373_v4 = vld [vmem:[%s4666_s1 + $0x10] sm:$0xf] }
   0xd   : > { %3574 = vmatpush.msk.msra.mxu3 %vm354_vm0, %v244_v0  ;;  %s3575_s24 = smul.u32 344, %s4670_s13  ;;  %3201 = vmatpush.msk.msra.mxu0 %vm354_vm0, %v244_v0  ;;  %vm245_vm1 = vcmask 31744   ;;  %v1991_v29 = vld [vmem:[%s4666_s1 + $0x18] sm:$0xf]  ;;  %v2300_v30 = vld [vmem:[%s4666_s1 + $0x1c] sm:$0xf] }
   0xe   : > { %3275 = vmatpush.msk.msrb.mxu2 %vm354_vm0, %v755_v1  ;;  %3238 = vmatpush.msk.msrb.mxu1 %vm354_vm0, %v207_v3  ;;  %v1682_v31 = vld [vmem:[%s4666_s1 + $0x14] sm:$0xf]  ;;  %v2609_v36 = vld [vmem:[%s4666_s1 + $0x20] sm:$0xf]  ;;  %s3576_s11 = smul.u32 288, %s4670_s13  ;;  %vm3102_vm2 = vcmask 64512  }
   0xf   : > { %3312 = vmatpush.msk.msrb.mxu3 %vm354_vm0, %v1064_v2  ;;  %3349 = vmatpush.msk.msrb.mxu0 %vm354_vm0, %v1373_v4  ;;  %s3724_s27 = scalar_lea.vmem %s4665_s0, %s3575_s24 }
  0x10   : > { %v217_v5 = vld [vmem:[%s3724_s27 + $0x49] sm:$0xff]  ;;  %v226_v6 = vld [vmem:[%s3724_s27 + $0x91] sm:$0xff]  ;;  %v235_v7 = vld [vmem:[%s3724_s27 + $0xd9] sm:$0xff]  ;;  %s4397_s16 = scalar_lea.vmem %s4668_s3, %s3576_s11 }
  0x11   : > { %3211 = vmatmul.msk.f32.vlgmr.msra.gmra.mxu1 %vm245_vm1, %v217_v5  ;;  %3220 = vmatmul.msk.f32.vlgmr.msra.gmra.mxu2 %vm245_vm1, %v226_v6  ;;  %v208_v8 = vld [vmem:[%s3724_s27 + $0x1] sm:$0xff]  ;;  %v218_v9 = vld [vmem:[%s3724_s27 + $0x51] sm:$0xff]  ;;  %v227_v10 = vld [vmem:[%s3724_s27 + $0x99] sm:$0xff] }
  0x12   : > { %3229 = vmatmul.msk.f32.vlgmr.msra.gmra.mxu3 %vm245_vm1, %v235_v7  ;;  %3202 = vmatmul.msk.f32.vlgmr.msra.gmra.mxu0 %vm245_vm1, %v208_v8  ;;  %v236_v11 = vld [vmem:[%s3724_s27 + $0xe1] sm:$0xff]  ;;  %v209_v12 = vld [vmem:[%s3724_s27 + $0x9] sm:$0xff]  ;;  %v219_v13 = vld [vmem:[%s3724_s27 + $0x59] sm:$0xff] }
  0x13   : > { %v228_v14 = vld [vmem:[%s3724_s27 + $0xa1] sm:$0xff]  ;;  %v237_v15 = vld [vmem:[%s3724_s27 + $0xe9] sm:$0xff]  ;;  %v210_v16 = vld [vmem:[%s3724_s27 + $0x11] sm:$0xff]  ;;  %3423 = vmatpush.msk.msra.mxu2 %vm354_vm0, %v1991_v29  ;;  %3460 = vmatpush.msk.msra.mxu3 %vm354_vm0, %v2300_v30 }
  0x14   : > { %v220_v17 = vld [vmem:[%s3724_s27 + $0x61] sm:$0xff]  ;;  %v229_v18 = vld [vmem:[%s3724_s27 + $0xa9] sm:$0xff]  ;;  %v238_v19 = vld [vmem:[%s3724_s27 + $0xf1] sm:$0xff]  ;;  %3386 = vmatpush.msk.msra.mxu1 %vm354_vm0, %v1682_v31  ;;  %3497 = vmatpush.msk.msra.mxu0 %vm354_vm0, %v2609_v36 }
  0x15   : > { %v211_v20 = vld [vmem:[%s3724_s27 + $0x19] sm:$0xff]  ;;  %v221_v21 = vld [vmem:[%s3724_s27 + $0x69] sm:$0xff]  ;;  %v230_v22 = vld [vmem:[%s3724_s27 + $0xb1] sm:$0xff] }
  0x16   : > { %v239_v23 = vld [vmem:[%s3724_s27 + $0xf9] sm:$0xff]  ;;  %v212_v24 = vld [vmem:[%s3724_s27 + $0x21] sm:$0xff]  ;;  %v222_v25 = vld [vmem:[%s3724_s27 + $0x71] sm:$0xff] }
  0x17   : > { %v231_v26 = vld [vmem:[%s3724_s27 + $0xb9] sm:$0xff]  ;;  %v240_v27 = vld [vmem:[%s3724_s27 + $0x101] sm:$0xff]  ;;  %v213_v28 = vld [vmem:[%s3724_s27 + $0x29] sm:$0xff] }
  0x18   : > { %v223_v32 = vld [vmem:[%s3724_s27 + $0x79] sm:$0xff]  ;;  %v232_v33 = vld [vmem:[%s3724_s27 + $0xc1] sm:$0xff]  ;;  %v241_v34 = vld [vmem:[%s3724_s27 + $0x109] sm:$0xff] }
  0x19   : > { %3212 = vmatmul.msk.f32.gmra.mxu1 %vm245_vm1, %v218_v9  ;;  %3221 = vmatmul.msk.f32.gmra.mxu2 %vm245_vm1, %v227_v10  ;;  %v214_v35 = vld [vmem:[%s3724_s27 + $0x31] sm:$0xff]  ;;  %v224_v37 = vld [vmem:[%s3724_s27 + $0x81] sm:$0xff]  ;;  %v233_v38 = vld [vmem:[%s3724_s27 + $0xc9] sm:$0xff] }
  0x1a   : > { %3230 = vmatmul.msk.f32.gmra.mxu3 %vm245_vm1, %v236_v11  ;;  %3203 = vmatmul.msk.f32.gmra.mxu0 %vm245_vm1, %v209_v12  ;;  %v242_v39 = vld [vmem:[%s3724_s27 + $0x111] sm:$0xff]  ;;  %v215_v40 = vld [vmem:[%s3724_s27 + $0x39] sm:$0xff]  ;;  %v225_v41 = vld [vmem:[%s3724_s27 + $0x89] sm:$0xff] }
  0x1b   : > { %v234_v42 = vld [vmem:[%s3724_s27 + $0xd1] sm:$0xff]  ;;  %v243_v43 = vld [vmem:[%s3724_s27 + $0x119] sm:$0xff]  ;;  %v216_v44 = vld [vmem:[%s3724_s27 + $0x41] sm:$0xff] }
  0x1c   : > { %v171_v45 = vld [vmem:[%s3724_s27] sm:$0xff]  ;;  %v1028_v47 = vld [vmem:[%s3724_s27 + $0x12] sm:$0xff]  ;;  %v172_v49 = vld [vmem:[%s3724_s27 + $0x8] sm:$0xff] }
  0x1d   : > { %v719_v46 = vld [vmem:[%s3724_s27 + $0x2] sm:$0xff]  ;;  %v1337_v48 = vld [vmem:[%s3724_s27 + $0x13] sm:$0xff]  ;;  %v720_v50 = vld [vmem:[%s3724_s27 + $0xa] sm:$0xff] }
  0x1e   : > { %v1029_v51 = vld [vmem:[%s3724_s27 + $0x1a] sm:$0xff]  ;;  %v173_v53 = vld [vmem:[%s3724_s27 + $0x10] sm:$0xff]  ;;  %v1030_v54 = vld [vmem:[%s3724_s27 + $0x22] sm:$0xff] }
  0x1f   : > { %v1338_v52 = vld [vmem:[%s3724_s27 + $0x1b] sm:$0xff]  ;;  %v1339_v55 = vld [vmem:[%s3724_s27 + $0x23] sm:$0xff]  ;;  %v1340_v58 = vld [vmem:[%s3724_s27 + $0x2b] sm:$0xff] }
  0x20   : > { %v174_v56 = vld [vmem:[%s3724_s27 + $0x18] sm:$0xff]  ;;  %v1031_v57 = vld [vmem:[%s3724_s27 + $0x2a] sm:$0xff]  ;;  %v175_v59 = vld [vmem:[%s3724_s27 + $0x20] sm:$0xff] }
  0x21   : > { %3213 = vmatmul.msk.f32.gmra.mxu1 %vm245_vm1, %v219_v13  ;;  %3222 = vmatmul.msk.f32.gmra.mxu2 %vm245_vm1, %v228_v14  ;;  %v1032_v60 = vld [vmem:[%s3724_s27 + $0x32] sm:$0xff]  ;;  %v176_v62 = vld [vmem:[%s3724_s27 + $0x28] sm:$0xff]  ;;  %v1033_v63 = vld [vmem:[%s3724_s27 + $0x3a] sm:$0xff] }
  0x22   : > { %3231 = vmatmul.msk.f32.gmra.mxu3 %vm245_vm1, %v237_v15  ;;  %3204 = vmatmul.msk.f32.gmra.mxu0 %vm245_vm1, %v210_v16  ;;  %v1341_v61 = vld [vmem:[%s3724_s27 + $0x33] sm:$0xff]  ;;  %v1342_v0 = vld [vmem:[%s3724_s27 + $0x3b] sm:$0xff]  ;;  %v1343_v3 = vld [vmem:[%s3724_s27 + $0x43] sm:$0xff] }
  0x23   : > { %v177_v1 = vld [vmem:[%s3724_s27 + $0x30] sm:$0xff]  ;;  %v1034_v2 = vld [vmem:[%s3724_s27 + $0x42] sm:$0xff]  ;;  %v178_v5 = vld [vmem:[%s3724_s27 + $0x38] sm:$0xff] }
  0x24   : > { %v1035_v6 = vld [vmem:[%s3724_s27 + $0x4a] sm:$0xff]  ;;  %v179_v12 = vld [vmem:[%s3724_s27 + $0x40] sm:$0xff]  ;;  %v1036_v13 = vld [vmem:[%s3724_s27 + $0x52] sm:$0xff] }
  0x25   : > { %v1344_v8 = vld [vmem:[%s3724_s27 + $0x4b] sm:$0xff]  ;;  %v1345_v15 = vld [vmem:[%s3724_s27 + $0x53] sm:$0xff]  ;;  %v1347_v29 = vld [vmem:[%s3724_s27 + $0x63] sm:$0xff] }
  0x26   : > { %v1348_v36 = vld [vmem:[%s3724_s27 + $0x6b] sm:$0xff] }
  0x29   : > { %3214 = vmatmul.msk.f32.gmra.mxu1 %vm245_vm1, %v220_v17  ;;  %3223 = vmatmul.msk.f32.gmra.mxu2 %vm245_vm1, %v229_v18 }
  0x2a   : > { %3232 = vmatmul.msk.f32.gmra.mxu3 %vm245_vm1, %v238_v19  ;;  %3205 = vmatmul.msk.f32.gmra.mxu0 %vm245_vm1, %v211_v20  ;;  %v180_v19 = vld [vmem:[%s3724_s27 + $0x48] sm:$0xff]  ;;  %v1037_v20 = vld [vmem:[%s3724_s27 + $0x5a] sm:$0xff] }
  0x31   : > { %3215 = vmatmul.msk.f32.gmra.mxu1 %vm245_vm1, %v221_v21  ;;  %3224 = vmatmul.msk.f32.gmra.mxu2 %vm245_vm1, %v230_v22  ;;  %v1346_v22 = vld [vmem:[%s3724_s27 + $0x5b] sm:$0xff] }
  0x32   : > { %3233 = vmatmul.msk.f32.gmra.mxu3 %vm245_vm1, %v239_v23  ;;  %3206 = vmatmul.msk.f32.gmra.mxu0 %vm245_vm1, %v212_v24 }
  0x39   : > { %3216 = vmatmul.msk.f32.gmra.mxu1 %vm245_vm1, %v222_v25  ;;  %3225 = vmatmul.msk.f32.gmra.mxu2 %vm245_vm1, %v231_v26  ;;  %v181_v26 = vld [vmem:[%s3724_s27 + $0x50] sm:$0xff] }
  0x3a   : > { %3234 = vmatmul.msk.f32.gmra.mxu3 %vm245_vm1, %v240_v27  ;;  %3207 = vmatmul.msk.f32.gmra.mxu0 %vm245_vm1, %v213_v28  ;;  %v1038_v27 = vld [vmem:[%s3724_s27 + $0x62] sm:$0xff] }
  0x41   : > { %3217 = vmatmul.msk.f32.gmra.mxu1 %vm245_vm1, %v223_v32  ;;  %3226 = vmatmul.msk.f32.gmra.mxu2 %vm245_vm1, %v232_v33  ;;  %v182_v33 = vld [vmem:[%s3724_s27 + $0x58] sm:$0xff] }
  0x42   : > { %3235 = vmatmul.msk.f32.gmra.mxu3 %vm245_vm1, %v241_v34  ;;  %3208 = vmatmul.msk.f32.gmra.mxu0 %vm245_vm1, %v214_v35  ;;  %v1039_v34 = vld [vmem:[%s3724_s27 + $0x6a] sm:$0xff] }
  0x49   : > { %3218 = vmatmul.msk.f32.gmra.mxu1 %vm245_vm1, %v224_v37  ;;  %3227 = vmatmul.msk.f32.gmra.mxu2 %vm245_vm1, %v233_v38 }
  0x4a   : > { %3236 = vmatmul.msk.f32.gmra.mxu3 %vm245_vm1, %v242_v39  ;;  %3209 = vmatmul.msk.f32.gmra.mxu0 %vm245_vm1, %v215_v40  ;;  %v183_v40 = vld [vmem:[%s3724_s27 + $0x60] sm:$0xff] }
  0x51   : > { %3219 = vmatmul.msk.f32.gmra.mxu1 %vm245_vm1, %v225_v41  ;;  %3228 = vmatmul.msk.f32.gmra.mxu2 %vm245_vm1, %v234_v42  ;;  %v1040_v41 = vld [vmem:[%s3724_s27 + $0x72] sm:$0xff] }
  0x52   : > { %3237 = vmatmul.msk.f32.gmra.mxu3 %vm245_vm1, %v243_v43  ;;  %3210 = vmatmul.msk.f32.gmra.mxu0 %vm245_vm1, %v216_v44  ;;  %v1349_v43 = vld [vmem:[%s3724_s27 + $0x73] sm:$0xff] }
  0x59   : > { %3239 = vmatmul.msk.f32.vlgmr.msrb.gmra.mxu1 %vm245_vm1, %v171_v45  ;;  %3276 = vmatmul.msk.f32.vlgmr.msrb.gmra.mxu2 %vm245_vm1, %v719_v46 }
  0x5a   : > { %3313 = vmatmul.msk.f32.vlgmr.msrb.gmra.mxu3 %vm245_vm1, %v1028_v47  ;;  %3350 = vmatmul.msk.f32.vlgmr.msrb.gmra.mxu0 %vm245_vm1, %v1337_v48  ;;  %v1041_v48 = vld [vmem:[%s3724_s27 + $0x7a] sm:$0xff] }
  0x61   : > { %3240 = vmatmul.msk.f32.gmra.mxu1 %vm245_vm1, %v172_v49  ;;  %3277 = vmatmul.msk.f32.gmra.mxu2 %vm245_vm1, %v720_v50  ;;  %v1350_v50 = vld [vmem:[%s3724_s27 + $0x7b] sm:$0xff] }
  0x62   : > { %3314 = vmatmul.msk.f32.gmra.mxu3 %vm245_vm1, %v1029_v51  ;;  %3351 = vmatmul.msk.f32.gmra.mxu0 %vm245_vm1, %v1338_v52 }
  0x69   : > { %3241 = vmatmul.msk.f32.gmra.mxu1 %vm245_vm1, %v173_v53  ;;  %3278 = vmatmul.msk.f32.gmra.mxu2 %vm245_vm1, %v1028_v47  ;;  %v184_v47 = vld [vmem:[%s3724_s27 + $0x68] sm:$0xff] }
  0x6a   : > { %3315 = vmatmul.msk.f32.gmra.mxu3 %vm245_vm1, %v1030_v54  ;;  %3352 = vmatmul.msk.f32.gmra.mxu0 %vm245_vm1, %v1339_v55  ;;  %v1042_v55 = vld [vmem:[%s3724_s27 + $0x82] sm:$0xff] }
  0x71   : > { %3242 = vmatmul.msk.f32.gmra.mxu1 %vm245_vm1, %v174_v56  ;;  %3279 = vmatmul.msk.f32.gmra.mxu2 %vm245_vm1, %v1029_v51 }
  0x72   : > { %3316 = vmatmul.msk.f32.gmra.mxu3 %vm245_vm1, %v1031_v57  ;;  %3353 = vmatmul.msk.f32.gmra.mxu0 %vm245_vm1, %v1340_v58 }
  0x79   : > { %3243 = vmatmul.msk.f32.gmra.mxu1 %vm245_vm1, %v175_v59  ;;  %3280 = vmatmul.msk.f32.gmra.mxu2 %vm245_vm1, %v1030_v54  ;;  %v185_v54 = vld [vmem:[%s3724_s27 + $0x70] sm:$0xff] }
  0x7a   : > { %3317 = vmatmul.msk.f32.gmra.mxu3 %vm245_vm1, %v1032_v60  ;;  %3354 = vmatmul.msk.f32.gmra.mxu0 %vm245_vm1, %v1341_v61  ;;  %v186_v61 = vld [vmem:[%s3724_s27 + $0x78] sm:$0xff] }
  0x81   : > { %3244 = vmatmul.msk.f32.gmra.mxu1 %vm245_vm1, %v176_v62  ;;  %3281 = vmatmul.msk.f32.gmra.mxu2 %vm245_vm1, %v1031_v57  ;;  %v1351_v57 = vld [vmem:[%s3724_s27 + $0x83] sm:$0xff] }
  0x82   : > { %3318 = vmatmul.msk.f32.gmra.mxu3 %vm245_vm1, %v1033_v63  ;;  %3355 = vmatmul.msk.f32.gmra.mxu0 %vm245_vm1, %v1342_v0  ;;  %v1043_v62 = vld [vmem:[%s3724_s27 + $0x8a] sm:$0xff] }
  0x83   : > { %v1352_v0 = vld [vmem:[%s3724_s27 + $0x8b] sm:$0xff] }
  0x89   : > { %3245 = vmatmul.msk.f32.gmra.mxu1 %vm245_vm1, %v177_v1  ;;  %3282 = vmatmul.msk.f32.gmra.mxu2 %vm245_vm1, %v1032_v60 }
  0x8a   : > { %3319 = vmatmul.msk.f32.gmra.mxu3 %vm245_vm1, %v1034_v2  ;;  %3356 = vmatmul.msk.f32.gmra.mxu0 %vm245_vm1, %v1343_v3 }
  0x8e   : > { %v3865_v4 = vpop.f32.mrf.mxu1 }
  0x8f   : > { %v3869_v7 = vpop.f32.mrf.mxu0 }
  0x91   : > { %3246 = vmatmul.msk.f32.gmra.mxu1 %vm245_vm1, %v178_v5  ;;  %3283 = vmatmul.msk.f32.gmra.mxu2 %vm245_vm1, %v1033_v63  ;;  %v187_v5 = vld [vmem:[%s3724_s27 + $0x80] sm:$0xff] }
  0x92   : > { %3320 = vmatmul.msk.f32.gmra.mxu3 %vm245_vm1, %v1035_v6  ;;  %3357 = vmatmul.msk.f32.gmra.mxu0 %vm245_vm1, %v1344_v8 }
  0x94   : > { %v3876_v9 = vpop.f32.mrf.mxu2 }
  0x95   : > { %v3878_v10 = vpop.f32.mrf.mxu3 }
  0x96   : > { %v3880_v11 = vpop.f32.mrf.mxu1 }
  0x97   : > { %v3884_v14 = vpop.f32.mrf.mxu0 }
  0x99   : > { %3247 = vmatmul.msk.f32.gmra.mxu1 %vm245_vm1, %v179_v12  ;;  %3284 = vmatmul.msk.f32.gmra.mxu2 %vm245_vm1, %v1034_v2  ;;  %v1353_v12 = vld [vmem:[%s3724_s27 + $0x93] sm:$0xff] }
  0x9a   : > { %3321 = vmatmul.msk.f32.gmra.mxu3 %vm245_vm1, %v1036_v13  ;;  %3358 = vmatmul.msk.f32.gmra.mxu0 %vm245_vm1, %v1345_v15 }
  0x9c   : > { %v3891_v16 = vpop.f32.mrf.mxu2 }
  0x9d   : > { %v3893_v17 = vpop.f32.mrf.mxu3 }
  0x9e   : > { %v3895_v18 = vpop.f32.mrf.mxu1 }
  0x9f   : > { %v3899_v21 = vpop.f32.mrf.mxu0 }
  0xa1   : > { %3248 = vmatmul.msk.f32.gmra.mxu1 %vm245_vm1, %v180_v19  ;;  %3285 = vmatmul.msk.f32.gmra.mxu2 %vm245_vm1, %v1035_v6  ;;  %v1044_v6 = vld [vmem:[%s3724_s27 + $0x92] sm:$0xff] }
  0xa2   : > { %3322 = vmatmul.msk.f32.gmra.mxu3 %vm245_vm1, %v1037_v20  ;;  %3359 = vmatmul.msk.f32.gmra.mxu0 %vm245_vm1, %v1346_v22 }
  0xa4   : > { %v3906_v23 = vpop.f32.mrf.mxu2 }
  0xa5   : > { %v3908_v24 = vpop.f32.mrf.mxu3 }
  0xa6   : > { %v3910_v25 = vpop.f32.mrf.mxu1 }
  0xa7   : > { %v3914_v28 = vpop.f32.mrf.mxu0 }
  0xa9   : > { %3249 = vmatmul.msk.f32.gmra.mxu1 %vm245_vm1, %v181_v26  ;;  %3286 = vmatmul.msk.f32.gmra.mxu2 %vm245_vm1, %v1036_v13  ;;  %v188_v26 = vld [vmem:[%s3724_s27 + $0x88] sm:$0xff] }
  0xaa   : > { %3323 = vmatmul.msk.f32.gmra.mxu3 %vm245_vm1, %v1038_v27  ;;  %3360 = vmatmul.msk.f32.gmra.mxu0 %vm245_vm1, %v1347_v29  ;;  %v1045_v29 = vld [vmem:[%s3724_s27 + $0x9a] sm:$0xff] }
  0xac   : > { %v3921_v30 = vpop.f32.mrf.mxu2 }
  0xad   : > { %v3923_v31 = vpop.f32.mrf.mxu3 }
  0xae   : > { %v3925_v32 = vpop.f32.mrf.mxu1 }
  0xaf   : > { %v3929_v35 = vpop.f32.mrf.mxu0 }
  0xb1   : > { %3250 = vmatmul.msk.f32.gmra.mxu1 %vm245_vm1, %v182_v33  ;;  %3287 = vmatmul.msk.f32.gmra.mxu2 %vm245_vm1, %v1037_v20 }
  0xb2   : > { %3324 = vmatmul.msk.f32.gmra.mxu3 %vm245_vm1, %v1039_v34  ;;  %3361 = vmatmul.msk.f32.gmra.mxu0 %vm245_vm1, %v1348_v36 }
  0xb4   : > { %v3936_v37 = vpop.f32.mrf.mxu2 }
  0xb5   : > { %v3938_v38 = vpop.f32.mrf.mxu3 }
  0xb6   : > { %v3940_v39 = vpop.f32.mrf.mxu1 }
  0xb7   : > { %v3944_v42 = vpop.f32.mrf.mxu0 }
  0xb9   : > { %3251 = vmatmul.msk.f32.gmra.mxu1 %vm245_vm1, %v183_v40  ;;  %3288 = vmatmul.msk.f32.gmra.mxu2 %vm245_vm1, %v1038_v27 }
  0xba   : > { %3325 = vmatmul.msk.f32.gmra.mxu3 %vm245_vm1, %v1040_v41  ;;  %3362 = vmatmul.msk.f32.gmra.mxu0 %vm245_vm1, %v1349_v43 }
  0xbc   : > { %v3951_v44 = vpop.f32.mrf.mxu2 }
  0xbd   : > { %v3953_v45 = vpop.f32.mrf.mxu3 }
  0xbe   : > { %v3955_v46 = vpop.f32.mrf.mxu1 }
  0xbf   : > { %v3959_v49 = vpop.f32.mrf.mxu0 }
  0xc1   : > { %3252 = vmatmul.msk.f32.gmra.mxu1 %vm245_vm1, %v184_v47  ;;  %3289 = vmatmul.msk.f32.gmra.mxu2 %vm245_vm1, %v1039_v34  ;;  %v1354_v34 = vld [vmem:[%s3724_s27 + $0x9b] sm:$0xff] }
  0xc2   : > { %3326 = vmatmul.msk.f32.gmra.mxu3 %vm245_vm1, %v1041_v48  ;;  %3363 = vmatmul.msk.f32.gmra.mxu0 %vm245_vm1, %v1350_v50 }
  0xc4   : > { %v3966_v51 = vpop.f32.mrf.mxu2 }
  0xc5   : > { %v3968_v52 = vpop.f32.mrf.mxu3 }
  0xc6   : > { %v3970_v53 = vpop.f32.mrf.mxu1 }
  0xc7   : > { %v3974_v56 = vpop.f32.mrf.mxu0 }
  0xc9   : > { %3253 = vmatmul.msk.f32.gmra.mxu1 %vm245_vm1, %v185_v54  ;;  %3290 = vmatmul.msk.f32.gmra.mxu2 %vm245_vm1, %v1040_v41  ;;  %v1046_v54 = vld [vmem:[%s3724_s27 + $0xa2] sm:$0xff] }
  0xca   : > { %3327 = vmatmul.msk.f32.gmra.mxu3 %vm245_vm1, %v1042_v55  ;;  %3364 = vmatmul.msk.f32.gmra.mxu0 %vm245_vm1, %v1351_v57  ;;  %v1355_v57 = vld [vmem:[%s3724_s27 + $0xa3] sm:$0xff] }
  0xcc   : > { %v3981_v58 = vpop.f32.mrf.mxu2 }
  0xcd   : > { %v3983_v59 = vpop.f32.mrf.mxu3 }
  0xce   : > { %v3985_v60 = vpop.f32.mrf.mxu1 }
  0xcf   : > { %v3989_v63 = vpop.f32.mrf.mxu0 }
  0xd1   : > { %3254 = vmatmul.msk.f32.gmra.mxu1 %vm245_vm1, %v186_v61  ;;  %3291 = vmatmul.msk.f32.gmra.mxu2 %vm245_vm1, %v1041_v48  ;;  %v189_v48 = vld [vmem:[%s3724_s27 + $0x90] sm:$0xff] }
  0xd2   : > { %3328 = vmatmul.msk.f32.gmra.mxu3 %vm245_vm1, %v1043_v62  ;;  %3365 = vmatmul.msk.f32.gmra.mxu0 %vm245_vm1, %v1352_v0 }
  0xd4   : > { %v3996_v1 = vpop.f32.mrf.mxu2 }
  0xd5   : > { %v3998_v2 = vpop.f32.mrf.mxu3 }
  0xd6   : > { %v611_v3 = vpop.f32.mrf.mxu1 }
  0xd7   : > { %v1502_v8 = vpop.f32.mrf.mxu0  ;;  %v612_v13 = vadd.f32 %v611_v3, %v3869_v7 }
  0xd9   : > { %3255 = vmatmul.msk.f32.gmra.mxu1 %vm245_vm1, %v187_v5  ;;  %3292 = vmatmul.msk.f32.gmra.mxu2 %vm245_vm1, %v1042_v55 }
  0xda   : > { %3329 = vmatmul.msk.f32.gmra.mxu3 %vm245_vm1, %v1044_v6  ;;  %3366 = vmatmul.msk.f32.gmra.mxu0 %vm245_vm1, %v1353_v12 }
  0xdc   : > { %v884_v15 = vpop.f32.mrf.mxu2 }
  0xdd   : > { %v992_v19 = vadd.f32 %v884_v15, %v612_v13  ;;  %v1193_v20 = vpop.f32.mrf.mxu3  ;;  %v1047_v13 = vld [vmem:[%s3724_s27 + $0xaa] sm:$0xff] }
  0xde   : > { %v614_v22 = vpop.f32.mrf.mxu1 }
  0xdf   : > { %v1301_v27 = vadd.f32 %v1193_v20, %v992_v19  ;;  %v1505_v33 = vpop.f32.mrf.mxu0  ;;  %v615_v7 = vadd.f32 %v614_v22, %v3884_v14  ;;  %v1356_v19 = vld [vmem:[%s3724_s27 + $0xab] sm:$0xff] }
  0xe1   : > { %v4011_v36 = vadd.f32 %v1502_v8, %v1301_v27  ;;  %3256 = vmatmul.msk.f32.gmra.mxu1 %vm245_vm1, %v188_v26  ;;  %3293 = vmatmul.msk.f32.gmra.mxu2 %vm245_vm1, %v1043_v62  ;;  %v190_v8 = vld [vmem:[%s3724_s27 + $0x98] sm:$0xff] }
  0xe2   : > { %3330 = vmatmul.msk.f32.gmra.mxu3 %vm245_vm1, %v1045_v29  ;;  %3367 = vmatmul.msk.f32.gmra.mxu0 %vm245_vm1, %v1354_v34 }
  0xe4   : > { %v887_v40 = vpop.f32.mrf.mxu2 }
  0xe5   : > { %v993_v41 = vadd.f32 %v887_v40, %v615_v7  ;;  %v1196_v43 = vpop.f32.mrf.mxu3  ;;  %v1048_v7 = vld [vmem:[%s3724_s27 + $0xb2] sm:$0xff] }
  0xe6   : > { %v617_v47 = vpop.f32.mrf.mxu1 }
  0xe7   : > { %v1302_v50 = vadd.f32 %v1196_v43, %v993_v41  ;;  %v1508_v55 = vpop.f32.mrf.mxu0  ;;  %v618_v14 = vadd.f32 %v617_v47, %v3899_v21  ;;  %v1357_v41 = vld [vmem:[%s3724_s27 + $0xb3] sm:$0xff] }
  0xe9   : > { %v4021_v61 = vadd.f32 %v1505_v33, %v1302_v50  ;;  %3257 = vmatmul.msk.f32.gmra.mxu1 %vm245_vm1, %v189_v48  ;;  %3294 = vmatmul.msk.f32.gmra.mxu2 %vm245_vm1, %v1044_v6  ;;  %v191_v33 = vld [vmem:[%s3724_s27 + $0xa0] sm:$0xff] }
  0xea   : > { %3331 = vmatmul.msk.f32.gmra.mxu3 %vm245_vm1, %v1046_v54  ;;  %3368 = vmatmul.msk.f32.gmra.mxu0 %vm245_vm1, %v1355_v57 }
  0xec   : > { %v890_v62 = vpop.f32.mrf.mxu2 }
  0xed   : > { %v994_v0 = vadd.f32 %v890_v62, %v618_v14  ;;  %v1199_v3 = vpop.f32.mrf.mxu3  ;;  %v1049_v14 = vld [vmem:[%s3724_s27 + $0xba] sm:$0xff] }
  0xee   : > { %v620_v5 = vpop.f32.mrf.mxu1 }
  0xef   : > { %v1303_v12 = vadd.f32 %v1199_v3, %v994_v0  ;;  %v1511_v15 = vpop.f32.mrf.mxu0  ;;  %v621_v21 = vadd.f32 %v620_v5, %v3914_v28  ;;  %v1358_v0 = vld [vmem:[%s3724_s27 + $0xbb] sm:$0xff] }
  0xf1   : > { %v4031_v20 = vadd.f32 %v1508_v55, %v1303_v12  ;;  %3258 = vmatmul.msk.f32.gmra.mxu1 %vm245_vm1, %v190_v8  ;;  %3295 = vmatmul.msk.f32.gmra.mxu2 %vm245_vm1, %v1045_v29  ;;  %v192_v55 = vld [vmem:[%s3724_s27 + $0xa8] sm:$0xff] }
  0xf2   : > { %3332 = vmatmul.msk.f32.gmra.mxu3 %vm245_vm1, %v1047_v13  ;;  %3369 = vmatmul.msk.f32.gmra.mxu0 %vm245_vm1, %v1356_v19 }
  0xf4   : > { %v893_v6 = vpop.f32.mrf.mxu2 }
  0xf5   : > { %v995_v22 = vadd.f32 %v893_v6, %v621_v21  ;;  %v1202_v26 = vpop.f32.mrf.mxu3  ;;  %v1050_v21 = vld [vmem:[%s3724_s27 + $0xc2] sm:$0xff] }
  0xf6   : > { %v623_v27 = vpop.f32.mrf.mxu1 }
  0xf7   : > { %v1304_v34 = vadd.f32 %v1202_v26, %v995_v22  ;;  %v1514_v40 = vpop.f32.mrf.mxu0  ;;  %v624_v28 = vadd.f32 %v623_v27, %v3929_v35  ;;  %v1359_v22 = vld [vmem:[%s3724_s27 + $0xc3] sm:$0xff] }
  0xf9   : > { %v4041_v43 = vadd.f32 %v1511_v15, %v1304_v34  ;;  %3259 = vmatmul.msk.f32.gmra.mxu1 %vm245_vm1, %v191_v33  ;;  %3296 = vmatmul.msk.f32.gmra.mxu2 %vm245_vm1, %v1046_v54  ;;  %v193_v15 = vld [vmem:[%s3724_s27 + $0xb0] sm:$0xff] }
  0xfa   : > { %3333 = vmatmul.msk.f32.gmra.mxu3 %vm245_vm1, %v1048_v7  ;;  %3370 = vmatmul.msk.f32.gmra.mxu0 %vm245_vm1, %v1357_v41 }
  0xfc   : > { %v896_v29 = vpop.f32.mrf.mxu2 }
  0xfd   : > { %v996_v47 = vadd.f32 %v896_v29, %v624_v28  ;;  %v1205_v48 = vpop.f32.mrf.mxu3  ;;  %v1051_v28 = vld [vmem:[%s3724_s27 + $0xca] sm:$0xff] }
  0xfe   : > { %v626_v50 = vpop.f32.mrf.mxu1 }
  0xff   : > { %v1305_v57 = vadd.f32 %v1205_v48, %v996_v47  ;;  %v1517_v62 = vpop.f32.mrf.mxu0  ;;  %v627_v35 = vadd.f32 %v626_v50, %v3944_v42  ;;  %v1360_v47 = vld [vmem:[%s3724_s27 + $0xcb] sm:$0xff] }
 0x101   : > { %v4051_v3 = vadd.f32 %v1514_v40, %v1305_v57  ;;  %3260 = vmatmul.msk.f32.gmra.mxu1 %vm245_vm1, %v192_v55  ;;  %3297 = vmatmul.msk.f32.gmra.mxu2 %vm245_vm1, %v1047_v13  ;;  %v194_v40 = vld [vmem:[%s3724_s27 + $0xb8] sm:$0xff] }
 0x102   : > { %3334 = vmatmul.msk.f32.gmra.mxu3 %vm245_vm1, %v1049_v14  ;;  %3371 = vmatmul.msk.f32.gmra.mxu0 %vm245_vm1, %v1358_v0 }
 0x104   : > { %v899_v54 = vpop.f32.mrf.mxu2 }
 0x105   : > { %v997_v5 = vadd.f32 %v899_v54, %v627_v35  ;;  %v1208_v8 = vpop.f32.mrf.mxu3  ;;  %v1052_v35 = vld [vmem:[%s3724_s27 + $0xd2] sm:$0xff] }
 0x106   : > { %v629_v12 = vpop.f32.mrf.mxu1 }
 0x107   : > { %v1306_v19 = vadd.f32 %v1208_v8, %v997_v5  ;;  %v1520_v6 = vpop.f32.mrf.mxu0  ;;  %v630_v42 = vadd.f32 %v629_v12, %v3959_v49  ;;  %v1361_v5 = vld [vmem:[%s3724_s27 + $0xd3] sm:$0xff] }
 0x109   : > { %v4061_v26 = vadd.f32 %v1517_v62, %v1306_v19  ;;  %3261 = vmatmul.msk.f32.gmra.mxu1 %vm245_vm1, %v193_v15  ;;  %3298 = vmatmul.msk.f32.gmra.mxu2 %vm245_vm1, %v1048_v7  ;;  %v195_v62 = vld [vmem:[%s3724_s27 + $0xc0] sm:$0xff] }
 0x10a   : > { %3335 = vmatmul.msk.f32.gmra.mxu3 %vm245_vm1, %v1050_v21  ;;  %3372 = vmatmul.msk.f32.gmra.mxu0 %vm245_vm1, %v1359_v22 }
 0x10c   : > { %v902_v13 = vpop.f32.mrf.mxu2 }
 0x10d   : > { %v998_v27 = vadd.f32 %v902_v13, %v630_v42  ;;  %v1211_v33 = vpop.f32.mrf.mxu3  ;;  %v1053_v42 = vld [vmem:[%s3724_s27 + $0xda] sm:$0xff] }
 0x10e   : > { %v632_v34 = vpop.f32.mrf.mxu1 }
 0x10f   : > { %v1307_v41 = vadd.f32 %v1211_v33, %v998_v27  ;;  %v1523_v29 = vpop.f32.mrf.mxu0  ;;  %v633_v49 = vadd.f32 %v632_v34, %v3974_v56  ;;  %v1362_v27 = vld [vmem:[%s3724_s27 + $0xdb] sm:$0xff] }
 0x111   : > { %v4071_v48 = vadd.f32 %v1520_v6, %v1307_v41  ;;  %3262 = vmatmul.msk.f32.gmra.mxu1 %vm245_vm1, %v194_v40  ;;  %3299 = vmatmul.msk.f32.gmra.mxu2 %vm245_vm1, %v1049_v14  ;;  %v196_v6 = vld [vmem:[%s3724_s27 + $0xc8] sm:$0xff] }
 0x112   : > { %3336 = vmatmul.msk.f32.gmra.mxu3 %vm245_vm1, %v1051_v28  ;;  %3373 = vmatmul.msk.f32.gmra.mxu0 %vm245_vm1, %v1360_v47 }
 0x114   : > { %v905_v7 = vpop.f32.mrf.mxu2 }
 0x115   : > { %v999_v50 = vadd.f32 %v905_v7, %v633_v49  ;;  %v1214_v55 = vpop.f32.mrf.mxu3  ;;  %v1054_v49 = vld [vmem:[%s3724_s27 + $0xe2] sm:$0xff] }
 0x116   : > { %v635_v57 = vpop.f32.mrf.mxu1 }
 0x117   : > { %v1308_v0 = vadd.f32 %v1214_v55, %v999_v50  ;;  %v1526_v54 = vpop.f32.mrf.mxu0  ;;  %v636_v56 = vadd.f32 %v635_v57, %v3989_v63  ;;  %v1363_v50 = vld [vmem:[%s3724_s27 + $0xe3] sm:$0xff] }
 0x119   : > { %v4081_v8 = vadd.f32 %v1523_v29, %v1308_v0  ;;  %3263 = vmatmul.msk.f32.gmra.mxu1 %vm245_vm1, %v195_v62  ;;  %3300 = vmatmul.msk.f32.gmra.mxu2 %vm245_vm1, %v1050_v21  ;;  %v197_v29 = vld [vmem:[%s3724_s27 + $0xd0] sm:$0xff] }
 0x11a   : > { %3337 = vmatmul.msk.f32.gmra.mxu3 %vm245_vm1, %v1052_v35  ;;  %3374 = vmatmul.msk.f32.gmra.mxu0 %vm245_vm1, %v1361_v5 }
 0x11c   : > { %v908_v14 = vpop.f32.mrf.mxu2 }
 0x11d   : > { %v1000_v12 = vadd.f32 %v908_v14, %v636_v56  ;;  %v1217_v15 = vpop.f32.mrf.mxu3  ;;  %v1055_v56 = vld [vmem:[%s3724_s27 + $0xea] sm:$0xff] }
 0x11e   : > { %v638_v19 = vpop.f32.mrf.mxu1 }
 0x11f   : > { %v1309_v22 = vadd.f32 %v1217_v15, %v1000_v12  ;;  %v1529_v13 = vpop.f32.mrf.mxu0  ;;  %v639_v63 = vadd.f32 %v638_v19, %v3865_v4  ;;  %v1364_v12 = vld [vmem:[%s3724_s27 + $0xeb] sm:$0xff] }
 0x121   : > { %v4091_v33 = vadd.f32 %v1526_v54, %v1309_v22  ;;  %3264 = vmatmul.msk.f32.gmra.mxu1 %vm245_vm1, %v196_v6  ;;  %3301 = vmatmul.msk.f32.gmra.mxu2 %vm245_vm1, %v1051_v28  ;;  %v198_v54 = vld [vmem:[%s3724_s27 + $0xd8] sm:$0xff] }
 0x122   : > { %3338 = vmatmul.msk.f32.gmra.mxu3 %vm245_vm1, %v1053_v42  ;;  %3375 = vmatmul.msk.f32.gmra.mxu0 %vm245_vm1, %v1362_v27 }
 0x124   : > { %v911_v21 = vpop.f32.mrf.mxu2 }
 0x125   : > { %v1001_v34 = vadd.f32 %v911_v21, %v639_v63  ;;  %v1220_v40 = vpop.f32.mrf.mxu3  ;;  %v1056_v63 = vld [vmem:[%s3724_s27 + $0xf2] sm:$0xff] }
 0x126   : > { %v641_v41 = vpop.f32.mrf.mxu1 }
 0x127   : > { %v1310_v47 = vadd.f32 %v1220_v40, %v1001_v34  ;;  %v1532_v7 = vpop.f32.mrf.mxu0  ;;  %v642_v4 = vadd.f32 %v641_v41, %v3880_v11  ;;  %v1365_v34 = vld [vmem:[%s3724_s27 + $0xf3] sm:$0xff] }
 0x129   : > { %v4101_v55 = vadd.f32 %v1529_v13, %v1310_v47  ;;  %3265 = vmatmul.msk.f32.gmra.mxu1 %vm245_vm1, %v197_v29  ;;  %3302 = vmatmul.msk.f32.gmra.mxu2 %vm245_vm1, %v1052_v35  ;;  %v199_v13 = vld [vmem:[%s3724_s27 + $0xe0] sm:$0xff] }
 0x12a   : > { %3339 = vmatmul.msk.f32.gmra.mxu3 %vm245_vm1, %v1054_v49  ;;  %3376 = vmatmul.msk.f32.gmra.mxu0 %vm245_vm1, %v1363_v50 }
 0x12c   : > { %v914_v28 = vpop.f32.mrf.mxu2 }
 0x12d   : > { %v1002_v57 = vadd.f32 %v914_v28, %v642_v4  ;;  %v1223_v62 = vpop.f32.mrf.mxu3  ;;  %v1057_v4 = vld [vmem:[%s3724_s27 + $0xfa] sm:$0xff] }
 0x12e   : > { %v644_v0 = vpop.f32.mrf.mxu1 }
 0x12f   : > { %v1311_v5 = vadd.f32 %v1223_v62, %v1002_v57  ;;  %v1535_v14 = vpop.f32.mrf.mxu0  ;;  %v645_v11 = vadd.f32 %v644_v0, %v3895_v18  ;;  %v1366_v57 = vld [vmem:[%s3724_s27 + $0xfb] sm:$0xff] }
 0x131   : > { %v4111_v15 = vadd.f32 %v1532_v7, %v1311_v5  ;;  %3266 = vmatmul.msk.f32.gmra.mxu1 %vm245_vm1, %v198_v54  ;;  %3303 = vmatmul.msk.f32.gmra.mxu2 %vm245_vm1, %v1053_v42  ;;  %v200_v7 = vld [vmem:[%s3724_s27 + $0xe8] sm:$0xff] }
 0x132   : > { %3340 = vmatmul.msk.f32.gmra.mxu3 %vm245_vm1, %v1055_v56  ;;  %3377 = vmatmul.msk.f32.gmra.mxu0 %vm245_vm1, %v1364_v12 }
 0x134   : > { %v917_v35 = vpop.f32.mrf.mxu2 }
 0x135   : > { %v1003_v19 = vadd.f32 %v917_v35, %v645_v11  ;;  %v1226_v6 = vpop.f32.mrf.mxu3  ;;  %v1058_v11 = vld [vmem:[%s3724_s27 + $0x102] sm:$0xff] }
 0x136   : > { %v647_v22 = vpop.f32.mrf.mxu1 }
 0x137   : > { %v1312_v27 = vadd.f32 %v1226_v6, %v1003_v19  ;;  %v1538_v21 = vpop.f32.mrf.mxu0  ;;  %v648_v18 = vadd.f32 %v647_v22, %v3910_v25  ;;  %v1367_v19 = vld [vmem:[%s3724_s27 + $0x103] sm:$0xff] }
 0x139   : > { %v4121_v40 = vadd.f32 %v1535_v14, %v1312_v27  ;;  %3267 = vmatmul.msk.f32.gmra.mxu1 %vm245_vm1, %v199_v13  ;;  %3304 = vmatmul.msk.f32.gmra.mxu2 %vm245_vm1, %v1054_v49  ;;  %v201_v14 = vld [vmem:[%s3724_s27 + $0xf0] sm:$0xff] }
 0x13a   : > { %3341 = vmatmul.msk.f32.gmra.mxu3 %vm245_vm1, %v1056_v63  ;;  %3378 = vmatmul.msk.f32.gmra.mxu0 %vm245_vm1, %v1365_v34 }
 0x13c   : > { %v920_v42 = vpop.f32.mrf.mxu2 }
 0x13d   : > { %v1004_v41 = vadd.f32 %v920_v42, %v648_v18  ;;  %v1229_v29 = vpop.f32.mrf.mxu3  ;;  %v1059_v18 = vld [vmem:[%s3724_s27 + $0x10a] sm:$0xff] }
 0x13e   : > { %v650_v47 = vpop.f32.mrf.mxu1 }
 0x13f   : > { %v1313_v50 = vadd.f32 %v1229_v29, %v1004_v41  ;;  %v1541_v28 = vpop.f32.mrf.mxu0  ;;  %v651_v25 = vadd.f32 %v650_v47, %v3925_v32  ;;  %v1368_v41 = vld [vmem:[%s3724_s27 + $0x10b] sm:$0xff] }
 0x141   : > { %v4131_v62 = vadd.f32 %v1538_v21, %v1313_v50  ;;  %3268 = vmatmul.msk.f32.gmra.mxu1 %vm245_vm1, %v200_v7  ;;  %3305 = vmatmul.msk.f32.gmra.mxu2 %vm245_vm1, %v1055_v56  ;;  %v202_v21 = vld [vmem:[%s3724_s27 + $0xf8] sm:$0xff] }
 0x142   : > { %3342 = vmatmul.msk.f32.gmra.mxu3 %vm245_vm1, %v1057_v4  ;;  %3379 = vmatmul.msk.f32.gmra.mxu0 %vm245_vm1, %v1366_v57 }
 0x144   : > { %v923_v49 = vpop.f32.mrf.mxu2 }
 0x145   : > { %v1005_v0 = vadd.f32 %v923_v49, %v651_v25  ;;  %v1232_v54 = vpop.f32.mrf.mxu3  ;;  %v1060_v25 = vld [vmem:[%s3724_s27 + $0x112] sm:$0xff] }
 0x146   : > { %v653_v5 = vpop.f32.mrf.mxu1 }
 0x147   : > { %v1314_v12 = vadd.f32 %v1232_v54, %v1005_v0  ;;  %v1544_v35 = vpop.f32.mrf.mxu0  ;;  %v654_v32 = vadd.f32 %v653_v5, %v3940_v39  ;;  %v1369_v0 = vld [vmem:[%s3724_s27 + $0x113] sm:$0xff] }
 0x149   : > { %v4141_v6 = vadd.f32 %v1541_v28, %v1314_v12  ;;  %3269 = vmatmul.msk.f32.gmra.mxu1 %vm245_vm1, %v201_v14  ;;  %3306 = vmatmul.msk.f32.gmra.mxu2 %vm245_vm1, %v1056_v63  ;;  %v203_v28 = vld [vmem:[%s3724_s27 + $0x100] sm:$0xff] }
 0x14a   : > { %3343 = vmatmul.msk.f32.gmra.mxu3 %vm245_vm1, %v1058_v11  ;;  %3380 = vmatmul.msk.f32.gmra.mxu0 %vm245_vm1, %v1367_v19 }
 0x14c   : > { %v926_v56 = vpop.f32.mrf.mxu2 }
 0x14d   : > { %v1006_v22 = vadd.f32 %v926_v56, %v654_v32  ;;  %v1235_v13 = vpop.f32.mrf.mxu3  ;;  %v1061_v32 = vld [vmem:[%s3724_s27 + $0x11a] sm:$0xff] }
 0x14e   : > { %v656_v27 = vpop.f32.mrf.mxu1 }
 0x14f   : > { %v1315_v34 = vadd.f32 %v1235_v13, %v1006_v22  ;;  %v1547_v42 = vpop.f32.mrf.mxu0  ;;  %v657_v39 = vadd.f32 %v656_v27, %v3955_v46  ;;  %v1370_v22 = vld [vmem:[%s3724_s27 + $0x11b] sm:$0xff] }
 0x151   : > { %v4151_v29 = vadd.f32 %v1544_v35, %v1315_v34  ;;  %3270 = vmatmul.msk.f32.gmra.mxu1 %vm245_vm1, %v202_v21  ;;  %3307 = vmatmul.msk.f32.gmra.mxu2 %vm245_vm1, %v1057_v4  ;;  %v204_v35 = vld [vmem:[%s3724_s27 + $0x108] sm:$0xff] }
 0x152   : > { %3344 = vmatmul.msk.f32.gmra.mxu3 %vm245_vm1, %v1059_v18  ;;  %3381 = vmatmul.msk.f32.gmra.mxu0 %vm245_vm1, %v1368_v41 }
 0x154   : > { %v929_v63 = vpop.f32.mrf.mxu2 }
 0x155   : > { %v1007_v47 = vadd.f32 %v929_v63, %v657_v39  ;;  %v1238_v7 = vpop.f32.mrf.mxu3  ;;  %v1062_v39 = vld [vmem:[%s3724_s27 + $0x122] sm:$0xff] }
 0x156   : > { %v659_v50 = vpop.f32.mrf.mxu1 }
 0x157   : > { %v1316_v57 = vadd.f32 %v1238_v7, %v1007_v47  ;;  %v1550_v49 = vpop.f32.mrf.mxu0  ;;  %v660_v46 = vadd.f32 %v659_v50, %v3970_v53  ;;  %v1371_v47 = vld [vmem:[%s3724_s27 + $0x123] sm:$0xff] }
 0x159   : > { %v4161_v54 = vadd.f32 %v1547_v42, %v1316_v57  ;;  %3271 = vmatmul.msk.f32.gmra.mxu1 %vm245_vm1, %v203_v28  ;;  %3308 = vmatmul.msk.f32.gmra.mxu2 %vm245_vm1, %v1058_v11  ;;  %v205_v42 = vld [vmem:[%s3724_s27 + $0x110] sm:$0xff] }
 0x15a   : > { %3345 = vmatmul.msk.f32.gmra.mxu3 %vm245_vm1, %v1060_v25  ;;  %3382 = vmatmul.msk.f32.gmra.mxu0 %vm245_vm1, %v1369_v0 }
 0x15c   : > { %v932_v4 = vpop.f32.mrf.mxu2 }
 0x15d   : > { %v1008_v5 = vadd.f32 %v932_v4, %v660_v46  ;;  %v1241_v14 = vpop.f32.mrf.mxu3  ;;  %v1063_v46 = vld [vmem:[%s3724_s27 + $0x12a] sm:$0xff] }
 0x15e   : > { %v662_v12 = vpop.f32.mrf.mxu1 }
 0x15f   : > { %v1317_v19 = vadd.f32 %v1241_v14, %v1008_v5  ;;  %v1553_v56 = vpop.f32.mrf.mxu0  ;;  %v663_v53 = vadd.f32 %v662_v12, %v3985_v60  ;;  %v1372_v5 = vld [vmem:[%s3724_s27 + $0x12b] sm:$0xff] }
 0x161   : > { %v4171_v13 = vadd.f32 %v1550_v49, %v1317_v19  ;;  %3272 = vmatmul.msk.f32.gmra.mxu1 %vm245_vm1, %v204_v35  ;;  %3309 = vmatmul.msk.f32.gmra.mxu2 %vm245_vm1, %v1059_v18  ;;  %v206_v49 = vld [vmem:[%s3724_s27 + $0x118] sm:$0xff] }
 0x162   : > { %3346 = vmatmul.msk.f32.gmra.mxu3 %vm245_vm1, %v1061_v32  ;;  %3383 = vmatmul.msk.f32.gmra.mxu0 %vm245_vm1, %v1370_v22  ;;  %v1955_v22 = vld [vmem:[%s3724_s27 + $0x24] sm:$0xff] }
 0x164   : > { %v935_v11 = vpop.f32.mrf.mxu2 }
 0x165   : > { %v1009_v27 = vadd.f32 %v935_v11, %v663_v53  ;;  %v1244_v21 = vpop.f32.mrf.mxu3  ;;  %v2264_v11 = vld [vmem:[%s3724_s27 + $0x25] sm:$0xff] }
 0x166   : > { %v665_v34 = vpop.f32.mrf.mxu1 }
 0x167   : > { %v1318_v41 = vadd.f32 %v1244_v21, %v1009_v27  ;;  %v1556_v63 = vpop.f32.mrf.mxu0  ;;  %v666_v60 = vadd.f32 %v665_v34, %v3876_v9  ;;  %v2573_v21 = vld [vmem:[%s3724_s27 + $0x26] sm:$0xff] }
 0x169   : > { %v4181_v7 = vadd.f32 %v1553_v56, %v1318_v41  ;;  %3273 = vmatmul.msk.f32.gmra.mxu1 %vm245_vm1, %v205_v42  ;;  %3310 = vmatmul.msk.f32.gmra.mxu2 %vm245_vm1, %v1060_v25  ;;  %v1646_v56 = vld [vmem:[%s3724_s27 + $0x14] sm:$0xff] }
 0x16a   : > { %3347 = vmatmul.msk.f32.gmra.mxu3 %vm245_vm1, %v1062_v39  ;;  %3384 = vmatmul.msk.f32.gmra.mxu0 %vm245_vm1, %v1371_v47  ;;  %v1956_v47 = vld [vmem:[%s3724_s27 + $0x2c] sm:$0xff] }
 0x16c   : > { %v938_v18 = vpop.f32.mrf.mxu2 }
 0x16d   : > { %v1010_v50 = vadd.f32 %v938_v18, %v666_v60  ;;  %v1247_v28 = vpop.f32.mrf.mxu3  ;;  %v2265_v18 = vld [vmem:[%s3724_s27 + $0x2d] sm:$0xff] }
 0x16e   : > { %v668_v57 = vpop.f32.mrf.mxu1 }
 0x16f   : > { %v1319_v0 = vadd.f32 %v1247_v28, %v1010_v50  ;;  %v1559_v4 = vpop.f32.mrf.mxu0  ;;  %v669_v9 = vadd.f32 %v668_v57, %v3891_v16  ;;  %v2574_v28 = vld [vmem:[%s3724_s27 + $0x2e] sm:$0xff] }
 0x171   : > { %v4191_v25 = vadd.f32 %v1556_v63, %v1319_v0  ;;  %3274 = vmatmul.msk.f32.gmra.mxu1 %vm245_vm1, %v206_v49  ;;  %3311 = vmatmul.msk.f32.gmra.mxu2 %vm245_vm1, %v1061_v32  ;;  %v1647_v63 = vld [vmem:[%s3724_s27 + $0x1c] sm:$0xff] }
 0x172   : > { %3348 = vmatmul.msk.f32.gmra.mxu3 %vm245_vm1, %v1063_v46  ;;  %3385 = vmatmul.msk.f32.gmra.mxu0 %vm245_vm1, %v1372_v5  ;;  %v1957_v5 = vld [vmem:[%s3724_s27 + $0x34] sm:$0xff] }
 0x174   : > { %v941_v14 = vpop.f32.mrf.mxu2 }
 0x175   : > { %v1011_v12 = vadd.f32 %v941_v14, %v669_v9  ;;  %v1250_v35 = vpop.f32.mrf.mxu3  ;;  %v2266_v14 = vld [vmem:[%s3724_s27 + $0x35] sm:$0xff] }
 0x176   : > { %v671_v19 = vpop.f32.mrf.mxu1 }
 0x177   : > { %v1320_v53 = vadd.f32 %v1250_v35, %v1011_v12  ;;  %v1562_v27 = vpop.f32.mrf.mxu0  ;;  %v672_v16 = vadd.f32 %v671_v19, %v3906_v23  ;;  %v2575_v35 = vld [vmem:[%s3724_s27 + $0x36] sm:$0xff] }
 0x179   : > { %v4202_v32 = vadd.f32 %v1559_v4, %v1320_v53  ;;  %3387 = vmatmul.msk.f32.vlgmr.msra.gmra.mxu1 %vm245_vm1, %v1646_v56  ;;  %3424 = vmatmul.msk.f32.vlgmr.msra.gmra.mxu2 %vm245_vm1, %v1955_v22 }
 0x17a   : > { %3461 = vmatmul.msk.f32.vlgmr.msra.gmra.mxu3 %vm245_vm1, %v2264_v11  ;;  %3498 = vmatmul.msk.f32.vlgmr.msra.gmra.mxu0 %vm245_vm1, %v2573_v21  ;;  %v1958_v21 = vld [vmem:[%s3724_s27 + $0x3c] sm:$0xff] }
 0x17c   : > { %v944_v34 = vpop.f32.mrf.mxu2 }
 0x17d   : > { %v1012_v42 = vadd.f32 %v944_v34, %v672_v16  ;;  %v1253_v41 = vpop.f32.mrf.mxu3  ;;  %v2267_v34 = vld [vmem:[%s3724_s27 + $0x3d] sm:$0xff] }
 0x17e   : > { %v674_v39 = vpop.f32.mrf.mxu1 }
 0x17f   : > { %v1321_v60 = vadd.f32 %v1253_v41, %v1012_v42  ;;  %v1565_v50 = vpop.f32.mrf.mxu0  ;;  %v675_v23 = vadd.f32 %v674_v39, %v3921_v30 }
 0x181   : > { %v4213_v57 = vadd.f32 %v1562_v27, %v1321_v60  ;;  %3388 = vmatmul.msk.f32.gmra.mxu1 %vm245_vm1, %v1647_v63  ;;  %3425 = vmatmul.msk.f32.gmra.mxu2 %vm245_vm1, %v1956_v47 }
 0x182   : > { %3462 = vmatmul.msk.f32.gmra.mxu3 %vm245_vm1, %v2265_v18  ;;  %3499 = vmatmul.msk.f32.gmra.mxu0 %vm245_vm1, %v2574_v28 }
 0x184   : > { %v947_v49 = vpop.f32.mrf.mxu2 }
 0x185   : > { %v1013_v0 = vadd.f32 %v947_v49, %v675_v23  ;;  %v1256_v46 = vpop.f32.mrf.mxu3  ;;  %v2268_v23 = vld [vmem:[%s3724_s27 + $0x45] sm:$0xff] }
 0x186   : > { %v677_v4 = vpop.f32.mrf.mxu1 }
 0x187   : > { %v1322_v9 = vadd.f32 %v1256_v46, %v1013_v0  ;;  %v1568_v12 = vpop.f32.mrf.mxu0  ;;  %v678_v30 = vadd.f32 %v677_v4, %v3936_v37 }
 0x189   : > { %v4223_v19 = vadd.f32 %v1565_v50, %v1322_v9  ;;  %3389 = vmatmul.msk.f32.gmra.mxu1 %vm245_vm1, %v1955_v22  ;;  %3426 = vmatmul.msk.f32.gmra.mxu2 %vm245_vm1, %v1957_v5  ;;  %v2576_v22 = vld [vmem:[%s3724_s27 + $0x3e] sm:$0xff] }
 0x18a   : > { %3463 = vmatmul.msk.f32.gmra.mxu3 %vm245_vm1, %v2266_v14  ;;  %3500 = vmatmul.msk.f32.gmra.mxu0 %vm245_vm1, %v2575_v35  ;;  %v1959_v50 = vld [vmem:[%s3724_s27 + $0x44] sm:$0xff] }
 0x18c   : > { %v950_v56 = vpop.f32.mrf.mxu2 }
 0x18d   : > { %v1014_v53 = vadd.f32 %v950_v56, %v678_v30  ;;  %v1259_v11 = vpop.f32.mrf.mxu3  ;;  %v2269_v30 = vld [vmem:[%s3724_s27 + $0x4d] sm:$0xff] }
 0x18e   : > { %v680_v27 = vpop.f32.mrf.mxu1 }
 0x18f   : > { %v1323_v16 = vadd.f32 %v1259_v11, %v1014_v53  ;;  %v1571_v42 = vpop.f32.mrf.mxu0  ;;  %v681_v37 = vadd.f32 %v680_v27, %v3951_v44 }
 0x191   : > { %v4233_v41 = vadd.f32 %v1568_v12, %v1323_v16  ;;  %3390 = vmatmul.msk.f32.gmra.mxu1 %vm245_vm1, %v1956_v47  ;;  %3427 = vmatmul.msk.f32.gmra.mxu2 %vm245_vm1, %v1958_v21  ;;  %v2577_v47 = vld [vmem:[%s3724_s27 + $0x46] sm:$0xff] }
 0x192   : > { %3464 = vmatmul.msk.f32.gmra.mxu3 %vm245_vm1, %v2267_v34  ;;  %3501 = vmatmul.msk.f32.gmra.mxu0 %vm245_vm1, %v2576_v22  ;;  %v1960_v12 = vld [vmem:[%s3724_s27 + $0x4c] sm:$0xff] }
 0x194   : > { %v953_v39 = vpop.f32.mrf.mxu2 }
 0x195   : > { %v1015_v63 = vadd.f32 %v953_v39, %v681_v37  ;;  %v1262_v60 = vpop.f32.mrf.mxu3  ;;  %v2270_v37 = vld [vmem:[%s3724_s27 + $0x55] sm:$0xff] }
 0x196   : > { %v683_v18 = vpop.f32.mrf.mxu1 }
 0x197   : > { %v1324_v28 = vadd.f32 %v1262_v60, %v1015_v63  ;;  %v1574_v49 = vpop.f32.mrf.mxu0  ;;  %v684_v44 = vadd.f32 %v683_v18, %v3966_v51 }
 0x199   : > { %v4243_v0 = vadd.f32 %v1571_v42, %v1324_v28  ;;  %3391 = vmatmul.msk.f32.gmra.mxu1 %vm245_vm1, %v1957_v5  ;;  %3428 = vmatmul.msk.f32.gmra.mxu2 %vm245_vm1, %v1959_v50  ;;  %v2578_v5 = vld [vmem:[%s3724_s27 + $0x4e] sm:$0xff] }
 0x19a   : > { %3465 = vmatmul.msk.f32.gmra.mxu3 %vm245_vm1, %v2268_v23  ;;  %3502 = vmatmul.msk.f32.gmra.mxu0 %vm245_vm1, %v2577_v47  ;;  %v1961_v42 = vld [vmem:[%s3724_s27 + $0x54] sm:$0xff] }
 0x19c   : > { %v956_v46 = vpop.f32.mrf.mxu2 }
 0x19d   : > { %v1016_v4 = vadd.f32 %v956_v46, %v684_v44  ;;  %v1265_v9 = vpop.f32.mrf.mxu3  ;;  %v2271_v44 = vld [vmem:[%s3724_s27 + $0x5d] sm:$0xff] }
 0x19e   : > { %v686_v14 = vpop.f32.mrf.mxu1 }
 0x19f   : > { %v1325_v35 = vadd.f32 %v1265_v9, %v1016_v4  ;;  %v1577_v56 = vpop.f32.mrf.mxu0  ;;  %v687_v51 = vadd.f32 %v686_v14, %v3981_v58 }
 0x1a1   : > { %v4253_v53 = vadd.f32 %v1574_v49, %v1325_v35  ;;  %3392 = vmatmul.msk.f32.gmra.mxu1 %vm245_vm1, %v1958_v21  ;;  %3429 = vmatmul.msk.f32.gmra.mxu2 %vm245_vm1, %v1960_v12  ;;  %v2579_v21 = vld [vmem:[%s3724_s27 + $0x56] sm:$0xff] }
 0x1a2   : > { %3466 = vmatmul.msk.f32.gmra.mxu3 %vm245_vm1, %v2269_v30  ;;  %3503 = vmatmul.msk.f32.gmra.mxu0 %vm245_vm1, %v2578_v5  ;;  %v1962_v49 = vld [vmem:[%s3724_s27 + $0x5c] sm:$0xff] }
 0x1a4   : > { %v959_v11 = vpop.f32.mrf.mxu2 }
 0x1a5   : > { %v1017_v27 = vadd.f32 %v959_v11, %v687_v51  ;;  %v1268_v16 = vpop.f32.mrf.mxu3  ;;  %v2272_v51 = vld [vmem:[%s3724_s27 + $0x65] sm:$0xff] }
 0x1a6   : > { %v689_v34 = vpop.f32.mrf.mxu1 }
 0x1a7   : > { %v1326_v22 = vadd.f32 %v1268_v16, %v1017_v27  ;;  %v1580_v39 = vpop.f32.mrf.mxu0  ;;  %v690_v58 = vadd.f32 %v689_v34, %v3996_v1 }
 0x1a9   : > { %v4263_v63 = vadd.f32 %v1577_v56, %v1326_v22  ;;  %3393 = vmatmul.msk.f32.gmra.mxu1 %vm245_vm1, %v1959_v50  ;;  %3430 = vmatmul.msk.f32.gmra.mxu2 %vm245_vm1, %v1961_v42  ;;  %v2580_v50 = vld [vmem:[%s3724_s27 + $0x5e] sm:$0xff] }
 0x1aa   : > { %3467 = vmatmul.msk.f32.gmra.mxu3 %vm245_vm1, %v2270_v37  ;;  %3504 = vmatmul.msk.f32.gmra.mxu0 %vm245_vm1, %v2579_v21  ;;  %v1963_v56 = vld [vmem:[%s3724_s27 + $0x64] sm:$0xff] }
 0x1ac   : > { %v962_v60 = vpop.f32.mrf.mxu2 }
 0x1ad   : > { %v1018_v18 = vadd.f32 %v962_v60, %v690_v58  ;;  %v1271_v28 = vpop.f32.mrf.mxu3  ;;  %v2273_v58 = vld [vmem:[%s3724_s27 + $0x6d] sm:$0xff] }
 0x1ae   : > { %v692_v23 = vpop.f32.mrf.mxu1 }
 0x1af   : > { %v1327_v47 = vadd.f32 %v1271_v28, %v1018_v18  ;;  %v1583_v46 = vpop.f32.mrf.mxu0  ;;  %v693_v1 = vadd.f32 %v692_v23, %v3878_v10 }
 0x1b1   : > { %v4273_v4 = vadd.f32 %v1580_v39, %v1327_v47  ;;  %3394 = vmatmul.msk.f32.gmra.mxu1 %vm245_vm1, %v1960_v12  ;;  %3431 = vmatmul.msk.f32.gmra.mxu2 %vm245_vm1, %v1962_v49  ;;  %v2581_v12 = vld [vmem:[%s3724_s27 + $0x66] sm:$0xff] }
 0x1b2   : > { %3468 = vmatmul.msk.f32.gmra.mxu3 %vm245_vm1, %v2271_v44  ;;  %3505 = vmatmul.msk.f32.gmra.mxu0 %vm245_vm1, %v2580_v50  ;;  %v1964_v39 = vld [vmem:[%s3724_s27 + $0x6c] sm:$0xff] }
 0x1b4   : > { %v965_v9 = vpop.f32.mrf.mxu2 }
 0x1b5   : > { %v1019_v14 = vadd.f32 %v965_v9, %v693_v1  ;;  %v1274_v35 = vpop.f32.mrf.mxu3  ;;  %v2274_v1 = vld [vmem:[%s3724_s27 + $0x75] sm:$0xff] }
 0x1b6   : > { %v695_v30 = vpop.f32.mrf.mxu1 }
 0x1b7   : > { %v1328_v5 = vadd.f32 %v1274_v35, %v1019_v14  ;;  %v1586_v11 = vpop.f32.mrf.mxu0  ;;  %v696_v10 = vadd.f32 %v695_v30, %v3893_v17 }
 0x1b9   : > { %v4283_v27 = vadd.f32 %v1583_v46, %v1328_v5  ;;  %3395 = vmatmul.msk.f32.gmra.mxu1 %vm245_vm1, %v1961_v42  ;;  %3432 = vmatmul.msk.f32.gmra.mxu2 %vm245_vm1, %v1963_v56  ;;  %v2582_v42 = vld [vmem:[%s3724_s27 + $0x6e] sm:$0xff] }
 0x1ba   : > { %3469 = vmatmul.msk.f32.gmra.mxu3 %vm245_vm1, %v2272_v51  ;;  %3506 = vmatmul.msk.f32.gmra.mxu0 %vm245_vm1, %v2581_v12  ;;  %v1965_v46 = vld [vmem:[%s3724_s27 + $0x74] sm:$0xff] }
 0x1bc   : > { %v968_v16 = vpop.f32.mrf.mxu2 }
 0x1bd   : > { %v1020_v34 = vadd.f32 %v968_v16, %v696_v10  ;;  %v1277_v22 = vpop.f32.mrf.mxu3  ;;  %v2275_v10 = vld [vmem:[%s3724_s27 + $0x7d] sm:$0xff] }
 0x1be   : > { %v698_v37 = vpop.f32.mrf.mxu1 }
 0x1bf   : > { %v1329_v21 = vadd.f32 %v1277_v22, %v1020_v34  ;;  %v1589_v60 = vpop.f32.mrf.mxu0  ;;  %v699_v17 = vadd.f32 %v698_v37, %v3908_v24 }
 0x1c1   : > { %v4293_v18 = vadd.f32 %v1586_v11, %v1329_v21  ;;  %3396 = vmatmul.msk.f32.gmra.mxu1 %vm245_vm1, %v1962_v49  ;;  %3433 = vmatmul.msk.f32.gmra.mxu2 %vm245_vm1, %v1964_v39  ;;  %v2583_v49 = vld [vmem:[%s3724_s27 + $0x76] sm:$0xff] }
 0x1c2   : > { %3470 = vmatmul.msk.f32.gmra.mxu3 %vm245_vm1, %v2273_v58  ;;  %3507 = vmatmul.msk.f32.gmra.mxu0 %vm245_vm1, %v2582_v42  ;;  %v1966_v11 = vld [vmem:[%s3724_s27 + $0x7c] sm:$0xff] }
 0x1c4   : > { %v971_v28 = vpop.f32.mrf.mxu2 }
 0x1c5   : > { %v1021_v23 = vadd.f32 %v971_v28, %v699_v17  ;;  %v1280_v47 = vpop.f32.mrf.mxu3  ;;  %v2276_v17 = vld [vmem:[%s3724_s27 + $0x85] sm:$0xff] }
 0x1c6   : > { %v701_v44 = vpop.f32.mrf.mxu1 }
 0x1c7   : > { %v1330_v50 = vadd.f32 %v1280_v47, %v1021_v23  ;;  %v1592_v9 = vpop.f32.mrf.mxu0  ;;  %v702_v24 = vadd.f32 %v701_v44, %v3923_v31 }
 0x1c9   : > { %v4303_v14 = vadd.f32 %v1589_v60, %v1330_v50  ;;  %3397 = vmatmul.msk.f32.gmra.mxu1 %vm245_vm1, %v1963_v56  ;;  %3434 = vmatmul.msk.f32.gmra.mxu2 %vm245_vm1, %v1965_v46  ;;  %v2584_v56 = vld [vmem:[%s3724_s27 + $0x7e] sm:$0xff] }
 0x1ca   : > { %3471 = vmatmul.msk.f32.gmra.mxu3 %vm245_vm1, %v2274_v1  ;;  %3508 = vmatmul.msk.f32.gmra.mxu0 %vm245_vm1, %v2583_v49  ;;  %v1967_v60 = vld [vmem:[%s3724_s27 + $0x84] sm:$0xff] }
 0x1cc   : > { %v974_v35 = vpop.f32.mrf.mxu2 }
 0x1cd   : > { %v1022_v30 = vadd.f32 %v974_v35, %v702_v24  ;;  %v1283_v5 = vpop.f32.mrf.mxu3  ;;  %v2277_v24 = vld [vmem:[%s3724_s27 + $0x8d] sm:$0xff] }
 0x1ce   : > { %v704_v51 = vpop.f32.mrf.mxu1 }
 0x1cf   : > { %v1331_v12 = vadd.f32 %v1283_v5, %v1022_v30  ;;  %v1595_v16 = vpop.f32.mrf.mxu0  ;;  %v705_v31 = vadd.f32 %v704_v51, %v3938_v38 }
 0x1d1   : > { %v4313_v34 = vadd.f32 %v1592_v9, %v1331_v12  ;;  %3398 = vmatmul.msk.f32.gmra.mxu1 %vm245_vm1, %v1964_v39  ;;  %3435 = vmatmul.msk.f32.gmra.mxu2 %vm245_vm1, %v1966_v11  ;;  %v2585_v39 = vld [vmem:[%s3724_s27 + $0x86] sm:$0xff] }
 0x1d2   : > { %3472 = vmatmul.msk.f32.gmra.mxu3 %vm245_vm1, %v2275_v10  ;;  %3509 = vmatmul.msk.f32.gmra.mxu0 %vm245_vm1, %v2584_v56  ;;  %v1968_v9 = vld [vmem:[%s3724_s27 + $0x8c] sm:$0xff] }
 0x1d4   : > { %v977_v22 = vpop.f32.mrf.mxu2 }
 0x1d5   : > { %v1023_v37 = vadd.f32 %v977_v22, %v705_v31  ;;  %v1286_v21 = vpop.f32.mrf.mxu3  ;;  %v2278_v31 = vld [vmem:[%s3724_s27 + $0x95] sm:$0xff] }
 0x1d6   : > { %v707_v58 = vpop.f32.mrf.mxu1 }
 0x1d7   : > { %v1332_v42 = vadd.f32 %v1286_v21, %v1023_v37  ;;  %v1598_v28 = vpop.f32.mrf.mxu0  ;;  %v708_v38 = vadd.f32 %v707_v58, %v3953_v45 }
 0x1d9   : > { %v4323_v23 = vadd.f32 %v1595_v16, %v1332_v42  ;;  %3399 = vmatmul.msk.f32.gmra.mxu1 %vm245_vm1, %v1965_v46  ;;  %3436 = vmatmul.msk.f32.gmra.mxu2 %vm245_vm1, %v1967_v60  ;;  %v2586_v46 = vld [vmem:[%s3724_s27 + $0x8e] sm:$0xff] }
 0x1da   : > { %3473 = vmatmul.msk.f32.gmra.mxu3 %vm245_vm1, %v2276_v17  ;;  %3510 = vmatmul.msk.f32.gmra.mxu0 %vm245_vm1, %v2585_v39  ;;  %v1969_v16 = vld [vmem:[%s3724_s27 + $0x94] sm:$0xff] }
 0x1dc   : > { %v980_v47 = vpop.f32.mrf.mxu2 }
 0x1dd   : > { %v1024_v44 = vadd.f32 %v980_v47, %v708_v38  ;;  %v1289_v50 = vpop.f32.mrf.mxu3  ;;  %v2279_v38 = vld [vmem:[%s3724_s27 + $0x9d] sm:$0xff] }
 0x1de   : > { %v710_v1 = vpop.f32.mrf.mxu1 }
 0x1df   : > { %v1333_v49 = vadd.f32 %v1289_v50, %v1024_v44  ;;  %v1601_v35 = vpop.f32.mrf.mxu0  ;;  %v711_v45 = vadd.f32 %v710_v1, %v3968_v52 }
 0x1e1   : > { %v4333_v30 = vadd.f32 %v1598_v28, %v1333_v49  ;;  %3400 = vmatmul.msk.f32.gmra.mxu1 %vm245_vm1, %v1966_v11  ;;  %3437 = vmatmul.msk.f32.gmra.mxu2 %vm245_vm1, %v1968_v9  ;;  %v2587_v11 = vld [vmem:[%s3724_s27 + $0x96] sm:$0xff] }
 0x1e2   : > { %3474 = vmatmul.msk.f32.gmra.mxu3 %vm245_vm1, %v2277_v24  ;;  %3511 = vmatmul.msk.f32.gmra.mxu0 %vm245_vm1, %v2586_v46  ;;  %v1970_v28 = vld [vmem:[%s3724_s27 + $0x9c] sm:$0xff] }
 0x1e4   : > { %v983_v5 = vpop.f32.mrf.mxu2 }
 0x1e5   : > { %v1025_v51 = vadd.f32 %v983_v5, %v711_v45  ;;  %v1292_v12 = vpop.f32.mrf.mxu3  ;;  %v2280_v45 = vld [vmem:[%s3724_s27 + $0xa5] sm:$0xff] }
 0x1e6   : > { %v713_v10 = vpop.f32.mrf.mxu1 }
 0x1e7   : > { %v1334_v56 = vadd.f32 %v1292_v12, %v1025_v51  ;;  %v1604_v22 = vpop.f32.mrf.mxu0  ;;  %v714_v52 = vadd.f32 %v713_v10, %v3983_v59  ;;  %v2589_v51 = vld [vmem:[%s3724_s27 + $0xa6] sm:$0xff] }
 0x1e9   : > { %v4343_v37 = vadd.f32 %v1601_v35, %v1334_v56  ;;  %3401 = vmatmul.msk.f32.gmra.mxu1 %vm245_vm1, %v1967_v60  ;;  %3438 = vmatmul.msk.f32.gmra.mxu2 %vm245_vm1, %v1969_v16  ;;  %v2588_v60 = vld [vmem:[%s3724_s27 + $0x9e] sm:$0xff] }
 0x1ea   : > { %3475 = vmatmul.msk.f32.gmra.mxu3 %vm245_vm1, %v2278_v31  ;;  %3512 = vmatmul.msk.f32.gmra.mxu0 %vm245_vm1, %v2587_v11  ;;  %v1971_v35 = vld [vmem:[%s3724_s27 + $0xa4] sm:$0xff] }
 0x1ec   : > { %v986_v21 = vpop.f32.mrf.mxu2 }
 0x1ed   : > { %v1026_v58 = vadd.f32 %v986_v21, %v714_v52  ;;  %v1295_v42 = vpop.f32.mrf.mxu3  ;;  %v4374_v52 = vld [vmem:[%s4667_s2] ss:$0 sm:$0xff] }
 0x1ee   : > { %v716_v17 = vpop.f32.mrf.mxu1 }
 0x1ef   : > { %v1335_v39 = vadd.f32 %v1295_v42, %v1026_v58  ;;  %v1607_v47 = vpop.f32.mrf.mxu0  ;;  %v717_v59 = vadd.f32 %v716_v17, %v3998_v2  ;;  %v2590_v58 = vld [vmem:[%s3724_s27 + $0xae] sm:$0xff] }
 0x1f1   : > { %v4353_v44 = vadd.f32 %v1604_v22, %v1335_v39  ;;  %3402 = vmatmul.msk.f32.gmra.mxu1 %vm245_vm1, %v1968_v9  ;;  %3439 = vmatmul.msk.f32.gmra.mxu2 %vm245_vm1, %v1970_v28  ;;  %v1972_v22 = vld [vmem:[%s3724_s27 + $0xac] sm:$0xff] }
 0x1f2   : > { %3476 = vmatmul.msk.f32.gmra.mxu3 %vm245_vm1, %v2279_v38  ;;  %3513 = vmatmul.msk.f32.gmra.mxu0 %vm245_vm1, %v2588_v60 }
 0x1f4   : > { %v989_v50 = vpop.f32.mrf.mxu2 }
 0x1f5   : > { %v1027_v1 = vadd.f32 %v989_v50, %v717_v59  ;;  %v1298_v49 = vpop.f32.mrf.mxu3  ;;  %v1973_v50 = vld [vmem:[%s3724_s27 + $0xb4] sm:$0xff] }
 0x1f6   : > { %v1811_v24 = vpop.f32.mrf.mxu1 }
 0x1f7   : > { %v1336_v46 = vadd.f32 %v1298_v49, %v1027_v1  ;;  %v2738_v5 = vpop.f32.mrf.mxu0  ;;  %v1919_v2 = vadd.f32 %v1811_v24, %v4011_v36  ;;  %v2282_v1 = vld [vmem:[%s3724_s27 + $0xb5] sm:$0xff] }
 0x1f8   : > { %v2591_v24 = vld [vmem:[%s3724_s27 + $0xb6] sm:$0xff] }
 0x1f9   : > { %v4363_v9 = vadd.f32 %v1607_v47, %v1336_v46  ;;  %3403 = vmatmul.msk.f32.gmra.mxu1 %vm245_vm1, %v1969_v16  ;;  %3440 = vmatmul.msk.f32.gmra.mxu2 %vm245_vm1, %v1971_v35  ;;  %v2281_v16 = vld [vmem:[%s3724_s27 + $0xad] sm:$0xff] }
 0x1fa   : > { %3477 = vmatmul.msk.f32.gmra.mxu3 %vm245_vm1, %v2280_v45  ;;  %3514 = vmatmul.msk.f32.gmra.mxu0 %vm245_vm1, %v2589_v51 }
 0x1fc   : > { %v2120_v12 = vpop.f32.mrf.mxu2 }
 0x1fd   : > { %v2228_v10 = vadd.f32 %v2120_v12, %v1919_v2  ;;  %v2429_v56 = vpop.f32.mrf.mxu3 }
 0x1fe   : > { %v1814_v31 = vpop.f32.mrf.mxu1 }
 0x1ff   : > { %v2537_v11 = vadd.f32 %v2429_v56, %v2228_v10  ;;  %v2741_v21 = vpop.f32.mrf.mxu0  ;;  %v1920_v36 = vadd.f32 %v1814_v31, %v4021_v61  ;;  %v1974_v31 = vld [vmem:[%s3724_s27 + $0xbc] sm:$0xff] }
 0x201   : > { %v2846_v42 = vadd.f32 %v2738_v5, %v2537_v11  ;;  %3404 = vmatmul.msk.f32.gmra.mxu1 %vm245_vm1, %v1970_v28  ;;  %3441 = vmatmul.msk.f32.gmra.mxu2 %vm245_vm1, %v1972_v22  ;;  %v2283_v11 = vld [vmem:[%s3724_s27 + $0xbd] sm:$0xff] }
 0x202   : > { %3478 = vmatmul.msk.f32.gmra.mxu3 %vm245_vm1, %v2281_v16  ;;  %3515 = vmatmul.msk.f32.gmra.mxu0 %vm245_vm1, %v2590_v58 }
 0x203   : > { %v2886_v17 = vadd.f32 %v4374_v52, %v2846_v42 }
 0x204   : > { %v2123_v39 = vpop.f32.mrf.mxu2 }
 0x205   : > { %v2958_v38 = vmul.f32 1.442695, %v2886_v17  ;;  %v2229_v47 = vadd.f32 %v2123_v39, %v1920_v36  ;;  %v2432_v60 = vpop.f32.mrf.mxu3  ;;  %vm2922_vm3 = vcmp.gt.f32.partialorder %v2886_v17, 0.0 }
 0x206   : > { %v1817_v59 = vpop.f32.mrf.mxu1 }
 0x207   : > { %3586 = vpow2.f32 %v2958_v38  ;;  %v2538_v28 = vadd.f32 %v2432_v60, %v2229_v47  ;;  %v2744_v49 = vpop.f32.mrf.mxu0  ;;  %v1921_v61 = vadd.f32 %v1817_v59, %v4031_v20 }
 0x209   : > { %v2847_v46 = vadd.f32 %v2741_v21, %v2538_v28  ;;  %3405 = vmatmul.msk.f32.gmra.mxu1 %vm245_vm1, %v1971_v35  ;;  %3442 = vmatmul.msk.f32.gmra.mxu2 %vm245_vm1, %v1973_v50  ;;  %v2592_v21 = vld [vmem:[%s3724_s27 + $0xbe] sm:$0xff] }
 0x20a   : > { %3479 = vmatmul.msk.f32.gmra.mxu3 %vm245_vm1, %v2282_v1  ;;  %3516 = vmatmul.msk.f32.gmra.mxu0 %vm245_vm1, %v2591_v24  ;;  %v1975_v1 = vld [vmem:[%s3724_s27 + $0xc4] sm:$0xff] }
 0x20b   : > { %v2887_v45 = vadd.f32 %v4374_v52, %v2847_v46  ;;  %v2284_v24 = vld [vmem:[%s3724_s27 + $0xc5] sm:$0xff] }
 0x20c   : > { %v2126_v5 = vpop.f32.mrf.mxu2 }
 0x20d   : > { %v3587_v51 = vpop.eup %3586  ;;  %v2960_v2 = vmul.f32 1.442695, %v2887_v45  ;;  %v2230_v12 = vadd.f32 %v2126_v5, %v1921_v61  ;;  %v2435_v10 = vpop.f32.mrf.mxu3  ;;  %vm2923_vm4 = vcmp.gt.f32.partialorder %v2887_v45, 0.0  ;;  %v2593_v61 = vld [vmem:[%s3724_s27 + $0xc6] sm:$0xff] }
 0x20e   : > { %v3534_v35 = vadd.f32 -1.0, %v3587_v51  ;;  %v1820_v56 = vpop.f32.mrf.mxu1 }
 0x20f   : > { %3588 = vpow2.f32 %v2960_v2  ;;  %v2539_v20 = vadd.f32 %v2435_v10, %v2230_v12  ;;  %v2747_v16 = vpop.f32.mrf.mxu0  ;;  %v1922_v36 = vadd.f32 %v1820_v56, %v4041_v43 }
 0x210   : > { %v3066_v58 = vsel %vm2922_vm3, %v2886_v17, %v3534_v35 }
 0x211   : > { %3103 = vst.msk [vmem:[%s4397_s16] sm:$0xff] %vm3102_vm2, %v3066_v58  ;;  %v2848_v42 = vadd.f32 %v2744_v49, %v2539_v20  ;;  %3406 = vmatmul.msk.f32.gmra.mxu1 %vm245_vm1, %v1972_v22  ;;  %3443 = vmatmul.msk.f32.gmra.mxu2 %vm245_vm1, %v1974_v31 }
 0x212   : > { %3480 = vmatmul.msk.f32.gmra.mxu3 %vm245_vm1, %v2283_v11  ;;  %3517 = vmatmul.msk.f32.gmra.mxu0 %vm245_vm1, %v2592_v21  ;;  %v1976_v11 = vld [vmem:[%s3724_s27 + $0xcc] sm:$0xff] }
 0x213   : > { %v2888_v39 = vadd.f32 %v4374_v52, %v2848_v42  ;;  %v2285_v21 = vld [vmem:[%s3724_s27 + $0xcd] sm:$0xff] }
 0x214   : > { %v2129_v17 = vpop.f32.mrf.mxu2  ;;  %v2594_v42 = vld [vmem:[%s3724_s27 + $0xce] sm:$0xff] }
 0x215   : > { %v3589_v38 = vpop.eup %3588  ;;  %v2962_v47 = vmul.f32 1.442695, %v2888_v39  ;;  %v2231_v60 = vadd.f32 %v2129_v17, %v1922_v36  ;;  %v2438_v59 = vpop.f32.mrf.mxu3  ;;  %vm2924_vm5 = vcmp.gt.f32.partialorder %v2888_v39, 0.0 }
 0x216   : > { %v3535_v28 = vadd.f32 -1.0, %v3589_v38  ;;  %v1823_v22 = vpop.f32.mrf.mxu1 }
 0x217   : > { %3590 = vpow2.f32 %v2962_v47  ;;  %v2540_v49 = vadd.f32 %v2438_v59, %v2231_v60  ;;  %v2750_v46 = vpop.f32.mrf.mxu0  ;;  %v1923_v51 = vadd.f32 %v1823_v22, %v4051_v3 }
 0x218   : > { %v3067_v5 = vsel %vm2923_vm4, %v2887_v45, %v3535_v28 }
 0x219   : > { %3104 = vst.msk [vmem:[%s4397_s16 + $0x8] sm:$0xff] %vm3102_vm2, %v3067_v5  ;;  %v2849_v43 = vadd.f32 %v2747_v16, %v2540_v49  ;;  %3407 = vmatmul.msk.f32.gmra.mxu1 %vm245_vm1, %v1973_v50  ;;  %3444 = vmatmul.msk.f32.gmra.mxu2 %vm245_vm1, %v1975_v1  ;;  %v1977_v49 = vld [vmem:[%s3724_s27 + $0xd4] sm:$0xff] }
 0x21a   : > { %3481 = vmatmul.msk.f32.gmra.mxu3 %vm245_vm1, %v2284_v24  ;;  %3518 = vmatmul.msk.f32.gmra.mxu0 %vm245_vm1, %v2593_v61  ;;  %v2595_v5 = vld [vmem:[%s3724_s27 + $0xd6] sm:$0xff] }
 0x21b   : > { %v2889_v2 = vadd.f32 %v4374_v52, %v2849_v43 }
 0x21c   : > { %v2132_v45 = vpop.f32.mrf.mxu2 }
 0x21d   : > { %v3591_v12 = vpop.eup %3590  ;;  %v2964_v10 = vmul.f32 1.442695, %v2889_v2  ;;  %v2232_v35 = vadd.f32 %v2132_v45, %v1923_v51  ;;  %v2441_v56 = vpop.f32.mrf.mxu3  ;;  %vm2925_vm6 = vcmp.gt.f32.partialorder %v2889_v2, 0.0 }
 0x21e   : > { %v3536_v20 = vadd.f32 -1.0, %v3591_v12  ;;  %v1826_v50 = vpop.f32.mrf.mxu1 }
 0x21f   : > { %3592 = vpow2.f32 %v2964_v10  ;;  %v2541_v16 = vadd.f32 %v2441_v56, %v2232_v35  ;;  %v2753_v58 = vpop.f32.mrf.mxu0  ;;  %v1924_v17 = vadd.f32 %v1826_v50, %v4061_v26  ;;  %v1978_v50 = vld [vmem:[%s3724_s27 + $0xdc] sm:$0xff] }
 0x220   : > { %v3068_v36 = vsel %vm2924_vm5, %v2888_v39, %v3536_v20 }
 0x221   : > { %3105 = vst.msk [vmem:[%s4397_s16 + $0x10] sm:$0xff] %vm3102_vm2, %v3068_v36  ;;  %v2850_v3 = vadd.f32 %v2750_v46, %v2541_v16  ;;  %3408 = vmatmul.msk.f32.gmra.mxu1 %vm245_vm1, %v1974_v31  ;;  %3445 = vmatmul.msk.f32.gmra.mxu2 %vm245_vm1, %v1976_v11  ;;  %v2286_v46 = vld [vmem:[%s3724_s27 + $0xd5] sm:$0xff] }
 0x222   : > { %3482 = vmatmul.msk.f32.gmra.mxu3 %vm245_vm1, %v2285_v21  ;;  %3519 = vmatmul.msk.f32.gmra.mxu0 %vm245_vm1, %v2594_v42  ;;  %v2287_v21 = vld [vmem:[%s3724_s27 + $0xdd] sm:$0xff] }
 0x223   : > { %v2890_v38 = vadd.f32 %v4374_v52, %v2850_v3  ;;  %v2596_v42 = vld [vmem:[%s3724_s27 + $0xde] sm:$0xff] }
 0x224   : > { %v2135_v39 = vpop.f32.mrf.mxu2 }
 0x225   : > { %v3593_v47 = vpop.eup %3592  ;;  %v2966_v60 = vmul.f32 1.442695, %v2890_v38  ;;  %v2233_v59 = vadd.f32 %v2135_v39, %v1924_v17  ;;  %v2444_v28 = vpop.f32.mrf.mxu3  ;;  %vm2926_vm7 = vcmp.gt.f32.partialorder %v2890_v38, 0.0 }
 0x226   : > { %v3537_v22 = vadd.f32 -1.0, %v3593_v47  ;;  %v1829_v31 = vpop.f32.mrf.mxu1 }
 0x227   : > { %3594 = vpow2.f32 %v2966_v60  ;;  %v2542_v24 = vadd.f32 %v2444_v28, %v2233_v59  ;;  %v2756_v61 = vpop.f32.mrf.mxu0  ;;  %v1925_v51 = vadd.f32 %v1829_v31, %v4071_v48 }
 0x228   : > { %v3069_v43 = vsel %vm2925_vm6, %v2889_v2, %v3537_v22  ;;  %v1979_v22 = vld [vmem:[%s3724_s27 + $0xe4] sm:$0xff] }
 0x229   : > { %3106 = vst.msk [vmem:[%s4397_s16 + $0x18] sm:$0xff] %vm3102_vm2, %v3069_v43  ;;  %v2851_v26 = vadd.f32 %v2753_v58, %v2542_v24  ;;  %3409 = vmatmul.msk.f32.gmra.mxu1 %vm245_vm1, %v1975_v1  ;;  %3446 = vmatmul.msk.f32.gmra.mxu2 %vm245_vm1, %v1977_v49  ;;  %v2288_v24 = vld [vmem:[%s3724_s27 + $0xe5] sm:$0xff] }
 0x22a   : > { %3483 = vmatmul.msk.f32.gmra.mxu3 %vm245_vm1, %v2286_v46  ;;  %3520 = vmatmul.msk.f32.gmra.mxu0 %vm245_vm1, %v2595_v5 }
 0x22b   : > { %v2891_v45 = vadd.f32 %v4374_v52, %v2851_v26 }
 0x22c   : > { %v2138_v2 = vpop.f32.mrf.mxu2 }
 0x22d   : > { %v3595_v12 = vpop.eup %3594  ;;  %v2968_v10 = vmul.f32 1.442695, %v2891_v45  ;;  %v2234_v35 = vadd.f32 %v2138_v2, %v1925_v51  ;;  %v2447_v56 = vpop.f32.mrf.mxu3  ;;  %vm2927_vm8 = vcmp.gt.f32.partialorder %v2891_v45, 0.0 }
 0x22e   : > { %v3538_v20 = vadd.f32 -1.0, %v3595_v12  ;;  %v1832_v1 = vpop.f32.mrf.mxu1 }
 0x22f   : > { %3596 = vpow2.f32 %v2968_v10  ;;  %v2543_v16 = vadd.f32 %v2447_v56, %v2234_v35  ;;  %v2759_v58 = vpop.f32.mrf.mxu0  ;;  %v1926_v3 = vadd.f32 %v1832_v1, %v4081_v8  ;;  %v1980_v56 = vld [vmem:[%s3724_s27 + $0xec] sm:$0xff] }
 0x230   : > { %v3070_v36 = vsel %vm2926_vm7, %v2890_v38, %v3538_v20  ;;  %v2289_v1 = vld [vmem:[%s3724_s27 + $0xed] sm:$0xff] }
 0x231   : > { %3107 = vst.msk [vmem:[%s4397_s16 + $0x20] sm:$0xff] %vm3102_vm2, %v3070_v36  ;;  %v2852_v48 = vadd.f32 %v2756_v61, %v2543_v16  ;;  %3410 = vmatmul.msk.f32.gmra.mxu1 %vm245_vm1, %v1976_v11  ;;  %3447 = vmatmul.msk.f32.gmra.mxu2 %vm245_vm1, %v1978_v50  ;;  %v2597_v61 = vld [vmem:[%s3724_s27 + $0xe6] sm:$0xff] }
 0x232   : > { %3484 = vmatmul.msk.f32.gmra.mxu3 %vm245_vm1, %v2287_v21  ;;  %3521 = vmatmul.msk.f32.gmra.mxu0 %vm245_vm1, %v2596_v42  ;;  %v2598_v21 = vld [vmem:[%s3724_s27 + $0xee] sm:$0xff] }
 0x233   : > { %v2892_v17 = vadd.f32 %v4374_v52, %v2852_v48 }
 0x234   : > { %v2141_v38 = vpop.f32.mrf.mxu2 }
 0x235   : > { %v3597_v39 = vpop.eup %3596  ;;  %v2970_v47 = vmul.f32 1.442695, %v2892_v17  ;;  %v2235_v60 = vadd.f32 %v2141_v38, %v1926_v3  ;;  %v2450_v59 = vpop.f32.mrf.mxu3  ;;  %vm2928_vm9 = vcmp.gt.f32.partialorder %v2892_v17, 0.0 }
 0x236   : > { %v3539_v28 = vadd.f32 -1.0, %v3597_v39  ;;  %v1835_v11 = vpop.f32.mrf.mxu1 }
 0x237   : > { %3598 = vpow2.f32 %v2970_v47  ;;  %v2544_v31 = vadd.f32 %v2450_v59, %v2235_v60  ;;  %v2762_v46 = vpop.f32.mrf.mxu0  ;;  %v1927_v43 = vadd.f32 %v1835_v11, %v4091_v33  ;;  %v1981_v60 = vld [vmem:[%s3724_s27 + $0xf4] sm:$0xff] }
 0x238   : > { %v3071_v5 = vsel %vm2927_vm8, %v2891_v45, %v3539_v28  ;;  %v2290_v28 = vld [vmem:[%s3724_s27 + $0xf5] sm:$0xff] }
 0x239   : > { %3108 = vst.msk [vmem:[%s4397_s16 + $0x28] sm:$0xff] %vm3102_vm2, %v3071_v5  ;;  %v2853_v8 = vadd.f32 %v2759_v58, %v2544_v31  ;;  %3411 = vmatmul.msk.f32.gmra.mxu1 %vm245_vm1, %v1977_v49  ;;  %3448 = vmatmul.msk.f32.gmra.mxu2 %vm245_vm1, %v1979_v22  ;;  %v2599_v31 = vld [vmem:[%s3724_s27 + $0xf6] sm:$0xff] }
 0x23a   : > { %3485 = vmatmul.msk.f32.gmra.mxu3 %vm245_vm1, %v2288_v24  ;;  %3522 = vmatmul.msk.f32.gmra.mxu0 %vm245_vm1, %v2597_v61 }
 0x23b   : > { %v2893_v26 = vadd.f32 %v4374_v52, %v2853_v8 }
 0x23c   : > { %v2144_v51 = vpop.f32.mrf.mxu2 }
 0x23d   : > { %v3599_v45 = vpop.eup %3598  ;;  %v2972_v2 = vmul.f32 1.442695, %v2893_v26  ;;  %v2236_v12 = vadd.f32 %v2144_v51, %v1927_v43  ;;  %v2453_v10 = vpop.f32.mrf.mxu3  ;;  %vm2929_vm10 = vcmp.gt.f32.partialorder %v2893_v26, 0.0 }
 0x23e   : > { %v3540_v35 = vadd.f32 -1.0, %v3599_v45  ;;  %v1838_v49 = vpop.f32.mrf.mxu1 }
 0x23f   : > { %3600 = vpow2.f32 %v2972_v2  ;;  %v2545_v20 = vadd.f32 %v2453_v10, %v2236_v12  ;;  %v2765_v16 = vpop.f32.mrf.mxu0  ;;  %v1928_v42 = vadd.f32 %v1838_v49, %v4101_v55  ;;  %v1982_v2 = vld [vmem:[%s3724_s27 + $0xfc] sm:$0xff] }
 0x240   : > { %v3072_v58 = vsel %vm2928_vm9, %v2892_v17, %v3540_v35  ;;  %v2291_v10 = vld [vmem:[%s3724_s27 + $0xfd] sm:$0xff] }
 0x241   : > { %3109 = vst.msk [vmem:[%s4397_s16 + $0x30] sm:$0xff] %vm3102_vm2, %v3072_v58  ;;  %v2854_v33 = vadd.f32 %v2762_v46, %v2545_v20  ;;  %3412 = vmatmul.msk.f32.gmra.mxu1 %vm245_vm1, %v1978_v50  ;;  %3449 = vmatmul.msk.f32.gmra.mxu2 %vm245_vm1, %v1980_v56  ;;  %v2600_v49 = vld [vmem:[%s3724_s27 + $0xfe] sm:$0xff] }
 0x242   : > { %3486 = vmatmul.msk.f32.gmra.mxu3 %vm245_vm1, %v2289_v1  ;;  %3523 = vmatmul.msk.f32.gmra.mxu0 %vm245_vm1, %v2598_v21 }
 0x243   : > { %v2894_v36 = vadd.f32 %v4374_v52, %v2854_v33 }
 0x244   : > { %v2147_v48 = vpop.f32.mrf.mxu2 }
 0x245   : > { %v3601_v3 = vpop.eup %3600  ;;  %v2974_v17 = vmul.f32 1.442695, %v2894_v36  ;;  %v2237_v38 = vadd.f32 %v2147_v48, %v1928_v42  ;;  %v2456_v39 = vpop.f32.mrf.mxu3  ;;  %vm2930_vm11 = vcmp.gt.f32.partialorder %v2894_v36, 0.0 }
 0x246   : > { %v3541_v47 = vadd.f32 -1.0, %v3601_v3  ;;  %v1841_v50 = vpop.f32.mrf.mxu1  ;;  %v1983_v3 = vld [vmem:[%s3724_s27 + $0x104] sm:$0xff] }
 0x247   : > { %3602 = vpow2.f32 %v2974_v17  ;;  %v2546_v59 = vadd.f32 %v2456_v39, %v2237_v38  ;;  %v2768_v11 = vpop.f32.mrf.mxu0  ;;  %v1929_v46 = vadd.f32 %v1841_v50, %v4111_v15  ;;  %v2292_v38 = vld [vmem:[%s3724_s27 + $0x105] sm:$0xff] }
 0x248   : > { %v3073_v24 = vsel %vm2929_vm10, %v2893_v26, %v3541_v47  ;;  %v2601_v47 = vld [vmem:[%s3724_s27 + $0x106] sm:$0xff] }
 0x249   : > { %3110 = vst.msk [vmem:[%s4397_s16 + $0x38] sm:$0xff] %vm3102_vm2, %v3073_v24  ;;  %v2855_v55 = vadd.f32 %v2765_v16, %v2546_v59  ;;  %3413 = vmatmul.msk.f32.gmra.mxu1 %vm245_vm1, %v1979_v22  ;;  %3450 = vmatmul.msk.f32.gmra.mxu2 %vm245_vm1, %v1981_v60 }
 0x24a   : > { %3487 = vmatmul.msk.f32.gmra.mxu3 %vm245_vm1, %v2290_v28  ;;  %3524 = vmatmul.msk.f32.gmra.mxu0 %vm245_vm1, %v2599_v31 }
 0x24b   : > { %v2895_v61 = vadd.f32 %v4374_v52, %v2855_v55 }
 0x24c   : > { %v2150_v5 = vpop.f32.mrf.mxu2 }
 0x24d   : > { %v3603_v8 = vpop.eup %3602  ;;  %v2976_v43 = vmul.f32 1.442695, %v2895_v61  ;;  %v2238_v26 = vadd.f32 %v2150_v5, %v1929_v46  ;;  %v2459_v51 = vpop.f32.mrf.mxu3  ;;  %vm2931_vm12 = vcmp.gt.f32.partialorder %v2895_v61, 0.0  ;;  %v1984_v5 = vld [vmem:[%s3724_s27 + $0x10c] sm:$0xff] }
 0x24e   : > { %v3542_v45 = vadd.f32 -1.0, %v3603_v8  ;;  %v1844_v22 = vpop.f32.mrf.mxu1 }
 0x24f   : > { %3604 = vpow2.f32 %v2976_v43  ;;  %v2547_v12 = vadd.f32 %v2459_v51, %v2238_v26  ;;  %v2771_v35 = vpop.f32.mrf.mxu0  ;;  %v1930_v1 = vadd.f32 %v1844_v22, %v4121_v40  ;;  %v2293_v43 = vld [vmem:[%s3724_s27 + $0x10d] sm:$0xff] }
 0x250   : > { %v3074_v20 = vsel %vm2930_vm11, %v2894_v36, %v3542_v45  ;;  %v2602_v51 = vld [vmem:[%s3724_s27 + $0x10e] sm:$0xff] }
 0x251   : > { %3111 = vst.msk [vmem:[%s4397_s16 + $0x40] sm:$0xff] %vm3102_vm2, %v3074_v20  ;;  %v2856_v15 = vadd.f32 %v2768_v11, %v2547_v12  ;;  %3414 = vmatmul.msk.f32.gmra.mxu1 %vm245_vm1, %v1980_v56  ;;  %3451 = vmatmul.msk.f32.gmra.mxu2 %vm245_vm1, %v1982_v2 }
 0x252   : > { %3488 = vmatmul.msk.f32.gmra.mxu3 %vm245_vm1, %v2291_v10  ;;  %3525 = vmatmul.msk.f32.gmra.mxu0 %vm245_vm1, %v2600_v49 }
 0x253   : > { %v2896_v16 = vadd.f32 %v4374_v52, %v2856_v15 }
 0x254   : > { %v2153_v21 = vpop.f32.mrf.mxu2 }
 0x255   : > { %v3605_v58 = vpop.eup %3604  ;;  %v2978_v33 = vmul.f32 1.442695, %v2896_v16  ;;  %v2239_v42 = vadd.f32 %v2153_v21, %v1930_v1  ;;  %v2462_v36 = vpop.f32.mrf.mxu3  ;;  %vm2932_vm13 = vcmp.gt.f32.partialorder %v2896_v16, 0.0 }
 0x256   : > { %v3543_v48 = vadd.f32 -1.0, %v3605_v58  ;;  %v1847_v56 = vpop.f32.mrf.mxu1  ;;  %v2294_v58 = vld [vmem:[%s3724_s27 + $0x115] sm:$0xff] }
 0x257   : > { %3606 = vpow2.f32 %v2978_v33  ;;  %v2548_v17 = vadd.f32 %v2462_v36, %v2239_v42  ;;  %v2774_v39 = vpop.f32.mrf.mxu0  ;;  %v1931_v59 = vadd.f32 %v1847_v56, %v4131_v62  ;;  %v2603_v42 = vld [vmem:[%s3724_s27 + $0x116] sm:$0xff] }
 0x258   : > { %v3075_v50 = vsel %vm2931_vm12, %v2895_v61, %v3543_v48 }
 0x259   : > { %3112 = vst.msk [vmem:[%s4397_s16 + $0x48] sm:$0xff] %vm3102_vm2, %v3075_v50  ;;  %v2857_v40 = vadd.f32 %v2771_v35, %v2548_v17  ;;  %3415 = vmatmul.msk.f32.gmra.mxu1 %vm245_vm1, %v1981_v60  ;;  %3452 = vmatmul.msk.f32.gmra.mxu2 %vm245_vm1, %v1983_v3 }
 0x25a   : > { %3489 = vmatmul.msk.f32.gmra.mxu3 %vm245_vm1, %v2292_v38  ;;  %3526 = vmatmul.msk.f32.gmra.mxu0 %vm245_vm1, %v2601_v47 }
 0x25b   : > { %v2897_v28 = vadd.f32 %v4374_v52, %v2857_v40 }
 0x25c   : > { %v2156_v11 = vpop.f32.mrf.mxu2 }
 0x25d   : > { %v3607_v31 = vpop.eup %3606  ;;  %v2980_v24 = vmul.f32 1.442695, %v2897_v28  ;;  %v2240_v55 = vadd.f32 %v2156_v11, %v1931_v59  ;;  %v2465_v46 = vpop.f32.mrf.mxu3  ;;  %vm2933_vm14 = vcmp.gt.f32.partialorder %v2897_v28, 0.0  ;;  %v1986_v59 = vld [vmem:[%s3724_s27 + $0x11c] sm:$0xff] }
 0x25e   : > { %v3544_v61 = vadd.f32 -1.0, %v3607_v31  ;;  %v1850_v60 = vpop.f32.mrf.mxu1  ;;  %v2295_v11 = vld [vmem:[%s3724_s27 + $0x11d] sm:$0xff] }
 0x25f   : > { %3608 = vpow2.f32 %v2980_v24  ;;  %v2549_v8 = vadd.f32 %v2465_v46, %v2240_v55  ;;  %v2777_v26 = vpop.f32.mrf.mxu0  ;;  %v1932_v22 = vadd.f32 %v1850_v60, %v4141_v6  ;;  %v2604_v24 = vld [vmem:[%s3724_s27 + $0x11e] sm:$0xff] }
 0x260   : > { %v3076_v45 = vsel %vm2932_vm13, %v2896_v16, %v3544_v61  ;;  %v1985_v16 = vld [vmem:[%s3724_s27 + $0x114] sm:$0xff] }
 0x261   : > { %3113 = vst.msk [vmem:[%s4397_s16 + $0x50] sm:$0xff] %vm3102_vm2, %v3076_v45  ;;  %v2858_v62 = vadd.f32 %v2774_v39, %v2549_v8  ;;  %3416 = vmatmul.msk.f32.gmra.mxu1 %vm245_vm1, %v1982_v2  ;;  %3453 = vmatmul.msk.f32.gmra.mxu2 %vm245_vm1, %v1984_v5 }
 0x262   : > { %3490 = vmatmul.msk.f32.gmra.mxu3 %vm245_vm1, %v2293_v43  ;;  %3527 = vmatmul.msk.f32.gmra.mxu0 %vm245_vm1, %v2602_v51 }
 0x263   : > { %v2898_v12 = vadd.f32 %v4374_v52, %v2858_v62  ;;  %v1987_v62 = vld [vmem:[%s3724_s27 + $0x124] sm:$0xff] }
 0x264   : > { %v2159_v10 = vpop.f32.mrf.mxu2 }
 0x265   : > { %v3609_v35 = vpop.eup %3608  ;;  %v2982_v49 = vmul.f32 1.442695, %v2898_v12  ;;  %v2241_v20 = vadd.f32 %v2159_v10, %v1932_v22  ;;  %v2468_v15 = vpop.f32.mrf.mxu3  ;;  %vm2934_vm15 = vcmp.gt.f32.partialorder %v2898_v12, 0.0 }
 0x266   : > { %v3545_v1 = vadd.f32 -1.0, %v3609_v35  ;;  %v1853_v2 = vpop.f32.mrf.mxu1  ;;  %v2605_v35 = vld [vmem:[%s3724_s27 + $0x126] sm:$0xff] }
 0x267   : > { %3610 = vpow2.f32 %v2982_v49  ;;  %v2550_v21 = vadd.f32 %v2468_v15, %v2241_v20  ;;  %v2780_v33 = vpop.f32.mrf.mxu0  ;;  %v1933_v48 = vadd.f32 %v1853_v2, %v4151_v29 }
 0x268   : > { %v3077_v36 = vsel %vm2933_vm14, %v2897_v28, %v3545_v1 }
 0x269   : > { %3114 = vst.msk [vmem:[%s4397_s16 + $0x58] sm:$0xff] %vm3102_vm2, %v3077_v36  ;;  %v2859_v6 = vadd.f32 %v2777_v26, %v2550_v21  ;;  %3417 = vmatmul.msk.f32.gmra.mxu1 %vm245_vm1, %v1983_v3  ;;  %3454 = vmatmul.msk.f32.gmra.mxu2 %vm245_vm1, %v1985_v16  ;;  %v1988_v36 = vld [vmem:[%s3724_s27 + $0x12c] sm:$0xff] }
 0x26a   : > { %3491 = vmatmul.msk.f32.gmra.mxu3 %vm245_vm1, %v2294_v58  ;;  %3528 = vmatmul.msk.f32.gmra.mxu0 %vm245_vm1, %v2603_v42 }
 0x26b   : > { %v2899_v56 = vadd.f32 %v4374_v52, %v2859_v6 }
 0x26c   : > { %v2162_v17 = vpop.f32.mrf.mxu2 }
 0x26d   : > { %v3611_v38 = vpop.eup %3610  ;;  %v2984_v39 = vmul.f32 1.442695, %v2899_v56  ;;  %v2242_v47 = vadd.f32 %v2162_v17, %v1933_v48  ;;  %v2471_v50 = vpop.f32.mrf.mxu3  ;;  %vm2935_vm0 = vcmp.gt.f32.partialorder %v2899_v56, 0.0  ;;  %v2297_v48 = vld [vmem:[%s3724_s27 + $0x12d] sm:$0xff] }
 0x26e   : > { %v3546_v40 = vadd.f32 -1.0, %v3611_v38  ;;  %v1856_v3 = vpop.f32.mrf.mxu1  ;;  %v2606_v17 = vld [vmem:[%s3724_s27 + $0x12e] sm:$0xff] }
 0x26f   : > { %3612 = vpow2.f32 %v2984_v39  ;;  %v2551_v28 = vadd.f32 %v2471_v50, %v2242_v47  ;;  %v2783_v31 = vpop.f32.mrf.mxu0  ;;  %v1934_v46 = vadd.f32 %v1856_v3, %v4161_v54 }
 0x270   : > { %v3078_v55 = vsel %vm2934_vm15, %v2898_v12, %v3546_v40  ;;  %v2296_v12 = vld [vmem:[%s3724_s27 + $0x125] sm:$0xff] }
 0x271   : > { %3115 = vst.msk [vmem:[%s4397_s16 + $0x60] sm:$0xff] %vm3102_vm2, %v3078_v55  ;;  %v2860_v29 = vadd.f32 %v2780_v33, %v2551_v28  ;;  %3418 = vmatmul.msk.f32.gmra.mxu1 %vm245_vm1, %v1984_v5  ;;  %3455 = vmatmul.msk.f32.gmra.mxu2 %vm245_vm1, %v1986_v59 }
 0x272   : > { %3492 = vmatmul.msk.f32.gmra.mxu3 %vm245_vm1, %v2295_v11  ;;  %3529 = vmatmul.msk.f32.gmra.mxu0 %vm245_vm1, %v2604_v24  ;;  %v1989_v24 = vld [vmem:[%s3724_s27 + $0x134] sm:$0xff] }
 0x273   : > { %v2900_v61 = vadd.f32 %v4374_v52, %v2860_v29  ;;  %v2298_v29 = vld [vmem:[%s3724_s27 + $0x135] sm:$0xff] }
 0x274   : > { %v2165_v60 = vpop.f32.mrf.mxu2 }
 0x275   : > { %v3613_v8 = vpop.eup %3612  ;;  %v2986_v43 = vmul.f32 1.442695, %v2900_v61  ;;  %v2243_v26 = vadd.f32 %v2165_v60, %v1934_v46  ;;  %v2474_v51 = vpop.f32.mrf.mxu3  ;;  %vm2936_vm3 = vcmp.gt.f32.partialorder %v2900_v61, 0.0 }
 0x276   : > { %v3547_v45 = vadd.f32 -1.0, %v3613_v8  ;;  %v1859_v5 = vpop.f32.mrf.mxu1 }
 0x277   : > { %3614 = vpow2.f32 %v2986_v43  ;;  %v2552_v22 = vadd.f32 %v2474_v51, %v2243_v26  ;;  %v2786_v10 = vpop.f32.mrf.mxu0  ;;  %v1935_v20 = vadd.f32 %v1859_v5, %v4171_v13 }
 0x278   : > { %v3079_v49 = vsel %vm2935_vm0, %v2899_v56, %v3547_v45 }
 0x279   : > { %3116 = vst.msk [vmem:[%s4397_s16 + $0x68] sm:$0xff] %vm3102_vm2, %v3079_v49  ;;  %v2861_v54 = vadd.f32 %v2783_v31, %v2552_v22  ;;  %3419 = vmatmul.msk.f32.gmra.mxu1 %vm245_vm1, %v1985_v16  ;;  %3456 = vmatmul.msk.f32.gmra.mxu2 %vm245_vm1, %v1987_v62  ;;  %v2299_v49 = vld [vmem:[%s3724_s27 + $0x13d] sm:$0xff] }
 0x27a   : > { %3493 = vmatmul.msk.f32.gmra.mxu3 %vm245_vm1, %v2296_v12  ;;  %3530 = vmatmul.msk.f32.gmra.mxu0 %vm245_vm1, %v2605_v35 }
 0x27b   : > { %v2901_v15 = vadd.f32 %v4374_v52, %v2861_v54 }
 0x27c   : > { %v2168_v1 = vpop.f32.mrf.mxu2 }
 0x27d   : > { %v3615_v2 = vpop.eup %3614  ;;  %v2988_v21 = vmul.f32 1.442695, %v2901_v15  ;;  %v2244_v58 = vadd.f32 %v2168_v1, %v1935_v20  ;;  %v2477_v33 = vpop.f32.mrf.mxu3  ;;  %vm2937_vm4 = vcmp.gt.f32.partialorder %v2901_v15, 0.0  ;;  %v2608_v20 = vld [vmem:[%s3724_s27 + $0x13e] sm:$0xff] }
 0x27e   : > { %v3548_v42 = vadd.f32 -1.0, %v3615_v2  ;;  %v1862_v16 = vpop.f32.mrf.mxu1 }
 0x27f   : > { %3616 = vpow2.f32 %v2988_v21  ;;  %v2553_v6 = vadd.f32 %v2477_v33, %v2244_v58  ;;  %v2789_v56 = vpop.f32.mrf.mxu0  ;;  %v1936_v39 = vadd.f32 %v1862_v16, %v4181_v7 }
 0x280   : > { %v3080_v38 = vsel %vm2936_vm3, %v2900_v61, %v3548_v42  ;;  %v2607_v61 = vld [vmem:[%s3724_s27 + $0x136] sm:$0xff] }
 0x281   : > { %3117 = vst.msk [vmem:[%s4397_s16 + $0x70] sm:$0xff] %vm3102_vm2, %v3080_v38  ;;  %v2862_v13 = vadd.f32 %v2786_v10, %v2553_v6  ;;  %3420 = vmatmul.msk.f32.gmra.mxu1 %vm245_vm1, %v1986_v59  ;;  %3457 = vmatmul.msk.f32.gmra.mxu2 %vm245_vm1, %v1988_v36  ;;  %v1990_v10 = vld [vmem:[%s3724_s27 + $0x13c] sm:$0xff] }
 0x282   : > { %3494 = vmatmul.msk.f32.gmra.mxu3 %vm245_vm1, %v2297_v48  ;;  %3531 = vmatmul.msk.f32.gmra.mxu0 %vm245_vm1, %v2606_v17 }
 0x283   : > { %v2902_v47 = vadd.f32 %v4374_v52, %v2862_v13 }
 0x284   : > { %v2171_v50 = vpop.f32.mrf.mxu2 }
 0x285   : > { %v3617_v40 = vpop.eup %3616  ;;  %v2990_v3 = vmul.f32 1.442695, %v2902_v47  ;;  %v2245_v28 = vadd.f32 %v2171_v50, %v1936_v39  ;;  %v2480_v11 = vpop.f32.mrf.mxu3  ;;  %vm2938_vm5 = vcmp.gt.f32.partialorder %v2902_v47, 0.0 }
 0x286   : > { %v3549_v31 = vadd.f32 -1.0, %v3617_v40  ;;  %v1865_v59 = vpop.f32.mrf.mxu1 }
 0x287   : > { %3618 = vpow2.f32 %v2990_v3  ;;  %v2554_v55 = vadd.f32 %v2480_v11, %v2245_v28  ;;  %v2792_v46 = vpop.f32.mrf.mxu0  ;;  %v1937_v8 = vadd.f32 %v1865_v59, %v4191_v25 }
 0x288   : > { %v3081_v60 = vsel %vm2937_vm4, %v2901_v15, %v3549_v31 }
 0x289   : > { %3118 = vst.msk [vmem:[%s4397_s16 + $0x78] sm:$0xff] %vm3102_vm2, %v3081_v60  ;;  %v2863_v7 = vadd.f32 %v2789_v56, %v2554_v55  ;;  %3421 = vmatmul.msk.f32.gmra.mxu1 %vm245_vm1, %v1987_v62  ;;  %3458 = vmatmul.msk.f32.gmra.mxu2 %vm245_vm1, %v1989_v24 }
 0x28a   : > { %3495 = vmatmul.msk.f32.gmra.mxu3 %vm245_vm1, %v2298_v29  ;;  %3532 = vmatmul.msk.f32.gmra.mxu0 %vm245_vm1, %v2607_v61 }
 0x28b   : > { %v2903_v43 = vadd.f32 %v4374_v52, %v2863_v7 }
 0x28c   : > { %v2174_v26 = vpop.f32.mrf.mxu2 }
 0x28d   : > { %v3619_v51 = vpop.eup %3618  ;;  %v2992_v45 = vmul.f32 1.442695, %v2903_v43  ;;  %v2246_v5 = vadd.f32 %v2174_v26, %v1937_v8  ;;  %v2483_v22 = vpop.f32.mrf.mxu3  ;;  %vm2939_vm6 = vcmp.gt.f32.partialorder %v2903_v43, 0.0 }
 0x28e   : > { %v3550_v12 = vadd.f32 -1.0, %v3619_v51  ;;  %v1868_v62 = vpop.f32.mrf.mxu1 }
 0x28f   : > { %3620 = vpow2.f32 %v2992_v45  ;;  %v2555_v35 = vadd.f32 %v2483_v22, %v2246_v5  ;;  %v2795_v54 = vpop.f32.mrf.mxu0  ;;  %v1938_v1 = vadd.f32 %v1868_v62, %v4202_v32 }
 0x290   : > { %v3082_v15 = vsel %vm2938_vm5, %v2902_v47, %v3550_v12 }
 0x291   : > { %3119 = vst.msk [vmem:[%s4397_s16 + $0x80] sm:$0xff] %vm3102_vm2, %v3082_v15  ;;  %v2864_v25 = vadd.f32 %v2792_v46, %v2555_v35  ;;  %3422 = vmatmul.msk.f32.gmra.mxu1 %vm245_vm1, %v1988_v36  ;;  %3459 = vmatmul.msk.f32.gmra.mxu2 %vm245_vm1, %v1990_v10 }
 0x292   : > { %3496 = vmatmul.msk.f32.gmra.mxu3 %vm245_vm1, %v2299_v49  ;;  %3533 = vmatmul.msk.f32.gmra.mxu0 %vm245_vm1, %v2608_v20 }
 0x293   : > { %v2904_v2 = vadd.f32 %v4374_v52, %v2864_v25 }
 0x294   : > { %v2177_v21 = vpop.f32.mrf.mxu2 }
 0x295   : > { %v3621_v58 = vpop.eup %3620  ;;  %v2994_v33 = vmul.f32 1.442695, %v2904_v2  ;;  %v2247_v42 = vadd.f32 %v2177_v21, %v1938_v1  ;;  %v2486_v16 = vpop.f32.mrf.mxu3  ;;  %vm2940_vm1 = vcmp.gt.f32.partialorder %v2904_v2, 0.0 }
 0x296   : > { %v3551_v6 = vadd.f32 -1.0, %v3621_v58  ;;  %v1871_v48 = vpop.f32.mrf.mxu1 }
 0x297   : > { %3622 = vpow2.f32 %v2994_v33  ;;  %v2556_v36 = vadd.f32 %v2486_v16, %v2247_v42  ;;  %v2798_v56 = vpop.f32.mrf.mxu0  ;;  %v1939_v32 = vadd.f32 %v1871_v48, %v4213_v57 }
 0x298   : > { %v3083_v17 = vsel %vm2939_vm6, %v2903_v43, %v3551_v6 }
 0x299   : > { %3120 = vst.msk [vmem:[%s4397_s16 + $0x88] sm:$0xff] %vm3102_vm2, %v3083_v17  ;;  %v2865_v38 = vadd.f32 %v2795_v54, %v2556_v36 }
 0x29b   : > { %v2905_v13 = vadd.f32 %v4374_v52, %v2865_v38 }
 0x29c   : > { %v2180_v39 = vpop.f32.mrf.mxu2 }
 0x29d   : > { %v3623_v47 = vpop.eup %3622  ;;  %v2996_v50 = vmul.f32 1.442695, %v2905_v13  ;;  %v2248_v40 = vadd.f32 %v2180_v39, %v1939_v32  ;;  %v2489_v3 = vpop.f32.mrf.mxu3  ;;  %vm2941_vm7 = vcmp.gt.f32.partialorder %v2905_v13, 0.0 }
 0x29e   : > { %v3552_v28 = vadd.f32 -1.0, %v3623_v47  ;;  %v1874_v11 = vpop.f32.mrf.mxu1 }
 0x29f   : > { %3624 = vpow2.f32 %v2996_v50  ;;  %v2557_v31 = vadd.f32 %v2489_v3, %v2248_v40  ;;  %v2801_v59 = vpop.f32.mrf.mxu0  ;;  %v1940_v57 = vadd.f32 %v1874_v11, %v4223_v19 }
 0x2a0   : > { %v3084_v24 = vsel %vm2940_vm1, %v2904_v2, %v3552_v28 }
 0x2a1   : > { %3121 = vst.msk [vmem:[%s4397_s16 + $0x90] sm:$0xff] %vm3102_vm2, %v3084_v24  ;;  %v2866_v55 = vadd.f32 %v2798_v56, %v2557_v31 }
 0x2a3   : > { %v2906_v29 = vadd.f32 %v4374_v52, %v2866_v55 }
 0x2a4   : > { %v2183_v46 = vpop.f32.mrf.mxu2 }
 0x2a5   : > { %v3625_v61 = vpop.eup %3624  ;;  %v2998_v60 = vmul.f32 1.442695, %v2906_v29  ;;  %v2249_v7 = vadd.f32 %v2183_v46, %v1940_v57  ;;  %v2492_v8 = vpop.f32.mrf.mxu3  ;;  %vm2942_vm8 = vcmp.gt.f32.partialorder %v2906_v29, 0.0 }
 0x2a6   : > { %v3553_v43 = vadd.f32 -1.0, %v3625_v61  ;;  %v1877_v26 = vpop.f32.mrf.mxu1 }
 0x2a7   : > { %3626 = vpow2.f32 %v2998_v60  ;;  %v2558_v51 = vadd.f32 %v2492_v8, %v2249_v7  ;;  %v2804_v45 = vpop.f32.mrf.mxu0  ;;  %v1941_v19 = vadd.f32 %v1877_v26, %v4233_v41 }
 0x2a8   : > { %v3085_v5 = vsel %vm2941_vm7, %v2905_v13, %v3553_v43 }
 0x2a9   : > { %3122 = vst.msk [vmem:[%s4397_s16 + $0x98] sm:$0xff] %vm3102_vm2, %v3085_v5  ;;  %v2867_v22 = vadd.f32 %v2801_v59, %v2558_v51 }
 0x2ab   : > { %v2907_v12 = vadd.f32 %v4374_v52, %v2867_v22 }
 0x2ac   : > { %v2186_v62 = vpop.f32.mrf.mxu2 }
 0x2ad   : > { %v3627_v10 = vpop.eup %3626  ;;  %v3000_v35 = vmul.f32 1.442695, %v2907_v12  ;;  %v2250_v49 = vadd.f32 %v2186_v62, %v1941_v19  ;;  %v2495_v54 = vpop.f32.mrf.mxu3  ;;  %vm2943_vm9 = vcmp.gt.f32.partialorder %v2907_v12, 0.0 }
 0x2ae   : > { %v3554_v20 = vadd.f32 -1.0, %v3627_v10  ;;  %v1880_v15 = vpop.f32.mrf.mxu1 }
 0x2af   : > { %3628 = vpow2.f32 %v3000_v35  ;;  %v2559_v25 = vadd.f32 %v2495_v54, %v2250_v49  ;;  %v2807_v1 = vpop.f32.mrf.mxu0  ;;  %v1942_v41 = vadd.f32 %v1880_v15, %v4243_v0 }
 0x2b0   : > { %v3086_v2 = vsel %vm2942_vm8, %v2906_v29, %v3554_v20 }
 0x2b1   : > { %3123 = vst.msk [vmem:[%s4397_s16 + $0xa0] sm:$0xff] %vm3102_vm2, %v3086_v2  ;;  %v2868_v21 = vadd.f32 %v2804_v45, %v2559_v25 }
 0x2b3   : > { %v2908_v58 = vadd.f32 %v4374_v52, %v2868_v21 }
 0x2b4   : > { %v2189_v33 = vpop.f32.mrf.mxu2 }
 0x2b5   : > { %v3629_v42 = vpop.eup %3628  ;;  %v3002_v16 = vmul.f32 1.442695, %v2908_v58  ;;  %v2251_v6 = vadd.f32 %v2189_v33, %v1942_v41  ;;  %v2498_v48 = vpop.f32.mrf.mxu3  ;;  %vm2944_vm10 = vcmp.gt.f32.partialorder %v2908_v58, 0.0 }
 0x2b6   : > { %v3555_v36 = vadd.f32 -1.0, %v3629_v42  ;;  %v1883_v56 = vpop.f32.mrf.mxu1 }
 0x2b7   : > { %3630 = vpow2.f32 %v3002_v16  ;;  %v2560_v17 = vadd.f32 %v2498_v48, %v2251_v6  ;;  %v2810_v38 = vpop.f32.mrf.mxu0  ;;  %v1943_v0 = vadd.f32 %v1883_v56, %v4253_v53 }
 0x2b8   : > { %v3087_v32 = vsel %vm2943_vm9, %v2907_v12, %v3555_v36 }
 0x2b9   : > { %3124 = vst.msk [vmem:[%s4397_s16 + $0xa8] sm:$0xff] %vm3102_vm2, %v3087_v32  ;;  %v2869_v13 = vadd.f32 %v2807_v1, %v2560_v17 }
 0x2bb   : > { %v2909_v39 = vadd.f32 %v4374_v52, %v2869_v13  ;;  %v4612_v52 = vld [vmem:[%s4667_s2] ss:$0 sm:$0xff] }
 0x2bc   : > { %v2192_v47 = vpop.f32.mrf.mxu2 }
 0x2bd   : > { %v3631_v50 = vpop.eup %3630  ;;  %v3004_v40 = vmul.f32 1.442695, %v2909_v39  ;;  %v2252_v3 = vadd.f32 %v2192_v47, %v1943_v0  ;;  %v2501_v28 = vpop.f32.mrf.mxu3  ;;  %vm2945_vm11 = vcmp.gt.f32.partialorder %v2909_v39, 0.0 }
 0x2be   : > { %v3556_v11 = vadd.f32 -1.0, %v3631_v50  ;;  %v1886_v31 = vpop.f32.mrf.mxu1 }
 0x2bf   : > { %3632 = vpow2.f32 %v3004_v40  ;;  %v2561_v59 = vadd.f32 %v2501_v28, %v2252_v3  ;;  %v2813_v24 = vpop.f32.mrf.mxu0  ;;  %v1944_v53 = vadd.f32 %v1886_v31, %v4263_v63 }
 0x2c0   : > { %v3088_v55 = vsel %vm2944_vm10, %v2908_v58, %v3556_v11 }
 0x2c1   : > { %3125 = vst.msk [vmem:[%s4397_s16 + $0xb0] sm:$0xff] %vm3102_vm2, %v3088_v55  ;;  %v2870_v57 = vadd.f32 %v2810_v38, %v2561_v59 }
 0x2c3   : > { %v2910_v29 = vadd.f32 %v4612_v52, %v2870_v57 }
 0x2c4   : > { %v2195_v46 = vpop.f32.mrf.mxu2 }
 0x2c5   : > { %v3633_v61 = vpop.eup %3632  ;;  %v3006_v60 = vmul.f32 1.442695, %v2910_v29  ;;  %v2253_v7 = vadd.f32 %v2195_v46, %v1944_v53  ;;  %v2504_v8 = vpop.f32.mrf.mxu3  ;;  %vm2946_vm12 = vcmp.gt.f32.partialorder %v2910_v29, 0.0 }
 0x2c6   : > { %v3557_v43 = vadd.f32 -1.0, %v3633_v61  ;;  %v1889_v26 = vpop.f32.mrf.mxu1 }
 0x2c7   : > { %3634 = vpow2.f32 %v3006_v60  ;;  %v2562_v51 = vadd.f32 %v2504_v8, %v2253_v7  ;;  %v2816_v45 = vpop.f32.mrf.mxu0  ;;  %v1945_v22 = vadd.f32 %v1889_v26, %v4273_v4 }
 0x2c8   : > { %v3089_v5 = vsel %vm2945_vm11, %v2909_v39, %v3557_v43 }
 0x2c9   : > { %3126 = vst.msk [vmem:[%s4397_s16 + $0xb8] sm:$0xff] %vm3102_vm2, %v3089_v5  ;;  %v2871_v63 = vadd.f32 %v2813_v24, %v2562_v51 }
 0x2cb   : > { %v2911_v19 = vadd.f32 %v4612_v52, %v2871_v63 }
 0x2cc   : > { %v2198_v12 = vpop.f32.mrf.mxu2 }
 0x2cd   : > { %v3635_v62 = vpop.eup %3634  ;;  %v3008_v10 = vmul.f32 1.442695, %v2911_v19  ;;  %v2254_v35 = vadd.f32 %v2198_v12, %v1945_v22  ;;  %v2507_v49 = vpop.f32.mrf.mxu3  ;;  %vm2947_vm13 = vcmp.gt.f32.partialorder %v2911_v19, 0.0 }
 0x2ce   : > { %v3558_v54 = vadd.f32 -1.0, %v3635_v62  ;;  %v1892_v20 = vpop.f32.mrf.mxu1 }
 0x2cf   : > { %3636 = vpow2.f32 %v3008_v10  ;;  %v2563_v15 = vadd.f32 %v2507_v49, %v2254_v35  ;;  %v2819_v25 = vpop.f32.mrf.mxu0  ;;  %v1946_v4 = vadd.f32 %v1892_v20, %v4283_v27 }
 0x2d0   : > { %v3090_v1 = vsel %vm2946_vm12, %v2910_v29, %v3558_v54 }
 0x2d1   : > { %3127 = vst.msk [vmem:[%s4397_s16 + $0xc0] sm:$0xff] %vm3102_vm2, %v3090_v1  ;;  %v2872_v2 = vadd.f32 %v2816_v45, %v2563_v15 }
 0x2d3   : > { %v2912_v21 = vadd.f32 %v4612_v52, %v2872_v2 }
 0x2d4   : > { %v2201_v41 = vpop.f32.mrf.mxu2 }
 0x2d5   : > { %v3637_v58 = vpop.eup %3636  ;;  %v3010_v33 = vmul.f32 1.442695, %v2912_v21  ;;  %v2255_v42 = vadd.f32 %v2201_v41, %v1946_v4  ;;  %v2510_v16 = vpop.f32.mrf.mxu3  ;;  %vm2948_vm14 = vcmp.gt.f32.partialorder %v2912_v21, 0.0 }
 0x2d6   : > { %v3559_v6 = vadd.f32 -1.0, %v3637_v58  ;;  %v1895_v48 = vpop.f32.mrf.mxu1 }
 0x2d7   : > { %3638 = vpow2.f32 %v3010_v33  ;;  %v2564_v36 = vadd.f32 %v2510_v16, %v2255_v42  ;;  %v2822_v56 = vpop.f32.mrf.mxu0  ;;  %v1947_v27 = vadd.f32 %v1895_v48, %v4293_v18 }
 0x2d8   : > { %v3091_v17 = vsel %vm2947_vm13, %v2911_v19, %v3559_v6 }
 0x2d9   : > { %3128 = vst.msk [vmem:[%s4397_s16 + $0xc8] sm:$0xff] %vm3102_vm2, %v3091_v17  ;;  %v2873_v38 = vadd.f32 %v2819_v25, %v2564_v36 }
 0x2db   : > { %v2913_v32 = vadd.f32 %v4612_v52, %v2873_v38 }
 0x2dc   : > { %v2204_v13 = vpop.f32.mrf.mxu2 }
 0x2dd   : > { %v3639_v0 = vpop.eup %3638  ;;  %v3012_v39 = vmul.f32 1.442695, %v2913_v32  ;;  %v2256_v47 = vadd.f32 %v2204_v13, %v1947_v27  ;;  %v2513_v50 = vpop.f32.mrf.mxu3  ;;  %vm2949_vm15 = vcmp.gt.f32.partialorder %v2913_v32, 0.0 }
 0x2de   : > { %v3560_v40 = vadd.f32 -1.0, %v3639_v0  ;;  %v1898_v3 = vpop.f32.mrf.mxu1 }
 0x2df   : > { %3640 = vpow2.f32 %v3012_v39  ;;  %v2565_v28 = vadd.f32 %v2513_v50, %v2256_v47  ;;  %v2825_v11 = vpop.f32.mrf.mxu0  ;;  %v1948_v18 = vadd.f32 %v1898_v3, %v4303_v14 }
 0x2e0   : > { %v3092_v31 = vsel %vm2948_vm14, %v2912_v21, %v3560_v40 }
 0x2e1   : > { %3129 = vst.msk [vmem:[%s4397_s16 + $0xd0] sm:$0xff] %vm3102_vm2, %v3092_v31  ;;  %v2874_v59 = vadd.f32 %v2822_v56, %v2565_v28 }
 0x2e3   : > { %v2914_v24 = vadd.f32 %v4612_v52, %v2874_v59 }
 0x2e4   : > { %v2207_v55 = vpop.f32.mrf.mxu2 }
 0x2e5   : > { %v3641_v57 = vpop.eup %3640  ;;  %v3014_v53 = vmul.f32 1.442695, %v2914_v24  ;;  %v2257_v29 = vadd.f32 %v2207_v55, %v1948_v18  ;;  %v2516_v46 = vpop.f32.mrf.mxu3  ;;  %vm2950_vm0 = vcmp.gt.f32.partialorder %v2914_v24, 0.0 }
 0x2e6   : > { %v3561_v61 = vadd.f32 -1.0, %v3641_v57  ;;  %v1901_v60 = vpop.f32.mrf.mxu1 }
 0x2e7   : > { %3642 = vpow2.f32 %v3014_v53  ;;  %v2566_v7 = vadd.f32 %v2516_v46, %v2257_v29  ;;  %v2828_v8 = vpop.f32.mrf.mxu0  ;;  %v1949_v14 = vadd.f32 %v1901_v60, %v4313_v34 }
 0x2e8   : > { %v3093_v43 = vsel %vm2949_vm15, %v2913_v32, %v3561_v61 }
 0x2e9   : > { %3130 = vst.msk [vmem:[%s4397_s16 + $0xd8] sm:$0xff] %vm3102_vm2, %v3093_v43  ;;  %v2875_v26 = vadd.f32 %v2825_v11, %v2566_v7 }
 0x2eb   : > { %v2915_v51 = vadd.f32 %v4612_v52, %v2875_v26 }
 0x2ec   : > { %v2210_v45 = vpop.f32.mrf.mxu2 }
 0x2ed   : > { %v3643_v5 = vpop.eup %3642  ;;  %v3016_v63 = vmul.f32 1.442695, %v2915_v51  ;;  %v2258_v22 = vadd.f32 %v2210_v45, %v1949_v14  ;;  %v2519_v19 = vpop.f32.mrf.mxu3  ;;  %vm2951_vm3 = vcmp.gt.f32.partialorder %v2915_v51, 0.0 }
 0x2ee   : > { %v3562_v12 = vadd.f32 -1.0, %v3643_v5  ;;  %v1904_v62 = vpop.f32.mrf.mxu1 }
 0x2ef   : > { %3644 = vpow2.f32 %v3016_v63  ;;  %v2567_v10 = vadd.f32 %v2519_v19, %v2258_v22  ;;  %v2831_v35 = vpop.f32.mrf.mxu0  ;;  %v1950_v34 = vadd.f32 %v1904_v62, %v4323_v23 }
 0x2f0   : > { %v3094_v49 = vsel %vm2950_vm0, %v2914_v24, %v3562_v12 }
 0x2f1   : > { %3131 = vst.msk [vmem:[%s4397_s16 + $0xe0] sm:$0xff] %vm3102_vm2, %v3094_v49  ;;  %v2876_v54 = vadd.f32 %v2828_v8, %v2567_v10 }
 0x2f3   : > { %v2916_v20 = vadd.f32 %v4612_v52, %v2876_v54 }
 0x2f4   : > { %v2213_v15 = vpop.f32.mrf.mxu2 }
 0x2f5   : > { %v3645_v25 = vpop.eup %3644  ;;  %v3018_v1 = vmul.f32 1.442695, %v2916_v20  ;;  %v2259_v2 = vadd.f32 %v2213_v15, %v1950_v34  ;;  %v2522_v4 = vpop.f32.mrf.mxu3  ;;  %vm2952_vm4 = vcmp.gt.f32.partialorder %v2916_v20, 0.0 }
 0x2f6   : > { %v3563_v21 = vadd.f32 -1.0, %v3645_v25  ;;  %v1907_v41 = vpop.f32.mrf.mxu1 }
 0x2f7   : > { %3646 = vpow2.f32 %v3018_v1  ;;  %v2568_v58 = vadd.f32 %v2522_v4, %v2259_v2  ;;  %v2834_v42 = vpop.f32.mrf.mxu0  ;;  %v1951_v23 = vadd.f32 %v1907_v41, %v4333_v30 }
 0x2f8   : > { %v3095_v33 = vsel %vm2951_vm3, %v2915_v51, %v3563_v21 }
 0x2f9   : > { %3132 = vst.msk [vmem:[%s4397_s16 + $0xe8] sm:$0xff] %vm3102_vm2, %v3095_v33  ;;  %v2877_v16 = vadd.f32 %v2831_v35, %v2568_v58 }
 0x2fb   : > { %v2917_v6 = vadd.f32 %v4612_v52, %v2877_v16 }
 0x2fc   : > { %v2216_v48 = vpop.f32.mrf.mxu2 }
 0x2fd   : > { %v3647_v36 = vpop.eup %3646  ;;  %v3020_v56 = vmul.f32 1.442695, %v2917_v6  ;;  %v2260_v17 = vadd.f32 %v2216_v48, %v1951_v23  ;;  %v2525_v38 = vpop.f32.mrf.mxu3  ;;  %vm2953_vm5 = vcmp.gt.f32.partialorder %v2917_v6, 0.0 }
 0x2fe   : > { %v3564_v27 = vadd.f32 -1.0, %v3647_v36  ;;  %v1910_v32 = vpop.f32.mrf.mxu1 }
 0x2ff   : > { %3648 = vpow2.f32 %v3020_v56  ;;  %v2569_v13 = vadd.f32 %v2525_v38, %v2260_v17  ;;  %v2837_v47 = vpop.f32.mrf.mxu0  ;;  %v1952_v30 = vadd.f32 %v1910_v32, %v4343_v37 }
 0x300   : > { %v3096_v0 = vsel %vm2952_vm4, %v2916_v20, %v3564_v27 }
 0x301   : > { %3133 = vst.msk [vmem:[%s4397_s16 + $0xf0] sm:$0xff] %vm3102_vm2, %v3096_v0  ;;  %v2878_v39 = vadd.f32 %v2834_v42, %v2569_v13 }
 0x303   : > { %v2918_v50 = vadd.f32 %v4612_v52, %v2878_v39 }
 0x304   : > { %v2219_v40 = vpop.f32.mrf.mxu2 }
 0x305   : > { %v3649_v3 = vpop.eup %3648  ;;  %v3022_v28 = vmul.f32 1.442695, %v2918_v50  ;;  %v2261_v11 = vadd.f32 %v2219_v40, %v1952_v30  ;;  %v2528_v31 = vpop.f32.mrf.mxu3  ;;  %vm2954_vm6 = vcmp.gt.f32.partialorder %v2918_v50, 0.0 }
 0x306   : > { %v3565_v59 = vadd.f32 -1.0, %v3649_v3  ;;  %v1913_v18 = vpop.f32.mrf.mxu1 }
 0x307   : > { %3650 = vpow2.f32 %v3022_v28  ;;  %v2570_v24 = vadd.f32 %v2528_v31, %v2261_v11  ;;  %v1953_v53 = vadd.f32 %v1913_v18, %v4353_v44  ;;  %v2840_v46 = vpop.f32.mrf.mxu0 }
 0x308   : > { %v3097_v55 = vsel %vm2953_vm5, %v2917_v6, %v3565_v59 }
 0x309   : > { %3134 = vst.msk [vmem:[%s4397_s16 + $0xf8] sm:$0xff] %vm3102_vm2, %v3097_v55  ;;  %v2879_v57 = vadd.f32 %v2837_v47, %v2570_v24 }
 0x30b   : > { %v2919_v37 = vadd.f32 %v4612_v52, %v2879_v57 }
 0x30c   : > { %v2222_v29 = vpop.f32.mrf.mxu2 }
 0x30d   : > { %v3651_v61 = vpop.eup %3650  ;;  %v3024_v60 = vmul.f32 1.442695, %v2919_v37  ;;  %v2262_v7 = vadd.f32 %v2222_v29, %v1953_v53  ;;  %v2531_v8 = vpop.f32.mrf.mxu3  ;;  %vm2955_vm1 = vcmp.gt.f32.partialorder %v2919_v37, 0.0 }
 0x30e   : > { %v3566_v43 = vadd.f32 -1.0, %v3651_v61  ;;  %v1916_v51 = vpop.f32.mrf.mxu1 }
 0x30f   : > { %3652 = vpow2.f32 %v3024_v60  ;;  %v2571_v26 = vadd.f32 %v2531_v8, %v2262_v7  ;;  %v1954_v44 = vadd.f32 %v1916_v51, %v4363_v9  ;;  %v2843_v35 = vpop.f32.mrf.mxu0 }
 0x310   : > { %v3098_v14 = vsel %vm2954_vm6, %v2918_v50, %v3566_v43 }
 0x311   : > { %3135 = vst.msk [vmem:[%s4397_s16 + $0x100] sm:$0xff] %vm3102_vm2, %v3098_v14  ;;  %v2880_v45 = vadd.f32 %v2840_v46, %v2571_v26 }
 0x313   : > { %v2920_v5 = vadd.f32 %v4612_v52, %v2880_v45 }
 0x314   : > { %v2225_v63 = vpop.f32.mrf.mxu2 }
 0x315   : > { %v3653_v22 = vpop.eup %3652  ;;  %v3026_v19 = vmul.f32 1.442695, %v2920_v5  ;;  %v2263_v12 = vadd.f32 %v2225_v63, %v1954_v44  ;;  %v2534_v62 = vpop.f32.mrf.mxu3  ;;  %vm2956_vm7 = vcmp.gt.f32.partialorder %v2920_v5, 0.0 }
 0x316   : > { %v3567_v10 = vadd.f32 -1.0, %v3653_v22 }
 0x317   : > { %3654 = vpow2.f32 %v3026_v19  ;;  %v2572_v49 = vadd.f32 %v2534_v62, %v2263_v12 }
 0x318   : > { %v3099_v54 = vsel %vm2955_vm1, %v2919_v37, %v3567_v10 }
 0x319   : > { %3136 = vst.msk [vmem:[%s4397_s16 + $0x108] sm:$0xff] %vm3102_vm2, %v3099_v54  ;;  %v2881_v34 = vadd.f32 %v2843_v35, %v2572_v49 }
 0x31b   : > { %v2921_v9 = vadd.f32 %v4612_v52, %v2881_v34 }
 0x31d   : > { %v3655_v20 = vpop.eup %3654  ;;  %v3028_v15 = vmul.f32 1.442695, %v2921_v9  ;;  %vm2957_vm8 = vcmp.gt.f32.partialorder %v2921_v9, 0.0 }
 0x31e   : > { %v3568_v25 = vadd.f32 -1.0, %v3655_v20 }
 0x31f   : > { %3656 = vpow2.f32 %v3028_v15 }
 0x320   : > { %v3100_v1 = vsel %vm2956_vm7, %v2920_v5, %v3568_v25 }
 0x321   : > { %3137 = vst.msk [vmem:[%s4397_s16 + $0x110] sm:$0xff] %vm3102_vm2, %v3100_v1 }
 0x325   : > { %v3657_v2 = vpop.eup %3656 }
 0x326   : > { %v3569_v4 = vadd.f32 -1.0, %v3657_v2 }
 0x328   : > { %v3101_v21 = vsel %vm2957_vm8, %v2921_v9, %v3569_v4 }
 0x329   : > { %3138 = vst.msk [vmem:[%s4397_s16 + $0x118] sm:$0xff] %vm3102_vm2, %v3101_v21 }
 0x32a PF: > { %s13_s12 = sadd.s32 1, %s3665_s12  }
 0x32b   : > { %p10_p4 = scmp.ge.s32.totalorder %s13_s12, 4  }
 0x32d   :  { %12 = sbr.rel (!%p10_p4) target bundleno = 1 (0x1), region = 62 }

</bundles_post_ra>
